<compile_context>
chip_gen: v5e
topology: v5e:2x2
jax: 0.10.0
libtpu: 0.0.40
codegen_flags: <defaults>
</compile_context>

<pallas_src>
import numpy as np

import jax
import jax.numpy as jnp
from jax.experimental import pallas as pl
from jax.experimental.pallas import tpu as pltpu


IMGS_PER_BLOCK = 8   # images folded into the matmul M dim per grid step
                     # (conv M = 2*IMGS*hp = 128; bump to 16 on v6e/v7x for
                     # large batches while keeping >= 2 parallel grid steps).


def _round_up(x, m):
    return ((x + m - 1) // m) * m


# ----------------------------------------------------------------------------
# Single fused kernel:
#   conv3x3(pad=1) + bias + ReLU + 2x2 maxpool + fc1 + ReLU + fc2 + ReLU
#   + fc3(->1) + sigmoid                                  (IMGS images / step)
# ----------------------------------------------------------------------------
def _fused_forward_kernel(xd_ref, wc_ref, bc_ref, w1_ref, b1_ref,
                          w2_ref, b2_ref, w3_ref, b3_ref, o_ref):
    """
    xd_ref: [4*IMGS*hp, Kp]   bf16  four shifted padded-row sets; row of set r:
                                    padded image row (2h+r) of image i lives at
                                    r*IMGS*hp + h*IMGS + i  (8-aligned slices).
    wc_ref: [3, Kp, 2*lanes]  bf16  block-Toeplitz conv weights per row tap;
                                    cols [:lanes]=even out cols, [lanes:]=odd.
    bc_ref: [1, lanes]        f32   conv bias tiled over pooled width.
    w1_ref: [hp, lanes, hid]  bf16  fc1 weights split per pooled row h.
    b1_ref: [1, hid]          f32
    w2_ref: [hid, hid]        bf16
    b2_ref: [1, hid]          f32
    w3_ref: [1, hid]          f32   fc3 weight row (out_features == 1).
    b3_ref: [1, 1]            f32
    o_ref : [IMGS, 1]         f32   sigmoid probabilities.
    """
    mh = xd_ref.shape[0] // 4          # IMGS * hp (rows per output-row parity)
    imgs = o_ref.shape[0]
    hp = mh // imgs
    lanes = wc_ref.shape[2] // 2
    hid = w1_ref.shape[2]

    # --- conv3x3 as 3 stacked-tap matmuls: tap t consumes rows
    #     [t*mh, (t+2)*mh) = [set_t ; set_{t+1}]  (even|odd output rows in M,
    #     even|odd output cols in N). Weight taps hit the MXU exactly once. ---
    res = jnp.dot(xd_ref[pl.ds(0, 2 * mh), :], wc_ref[0],
                  preferred_element_type=jnp.float32)
    res = res + jnp.dot(xd_ref[pl.ds(mh, 2 * mh), :], wc_ref[1],
                        preferred_element_type=jnp.float32)
    res = res + jnp.dot(xd_ref[pl.ds(2 * mh, 2 * mh), :], wc_ref[2],
                        preferred_element_type=jnp.float32)

    # Quadrants of the 2x2 pooling window (all slice starts are tile-aligned).
    ee = res[:mh, :lanes]
    eo = res[:mh, lanes:]
    oe = res[mh:, :lanes]
    oo = res[mh:, lanes:]
    # Fused maxpool + bias + ReLU (per-channel bias is constant over the 2x2
    # window and ReLU is monotonic, so the fold is exact).
    pooled = jnp.maximum(jnp.maximum(ee, eo), jnp.maximum(oe, oo))
    pooled = jnp.maximum(pooled + bc_ref[...], 0.0)   # [mh, lanes], rows (h, i)

    # --- classifier head, fully on-chip --------------------------------------
    # fc1 consumes the pooled layout directly (no flatten/relayout): one
    # [IMGS, lanes] @ [lanes, hid] accumulation per pooled row h.
    h1 = jnp.zeros((imgs, hid), jnp.float32)
    for h in range(hp):                               # static unroll (hp = 8)
        blk = pooled[h * imgs:(h + 1) * imgs, :].astype(jnp.bfloat16)
        h1 = h1 + jnp.dot(blk, w1_ref[h], preferred_element_type=jnp.float32)
    h1 = jnp.maximum(h1 + b1_ref[...], 0.0)

    h2 = jnp.dot(h1.astype(jnp.bfloat16), w2_ref[...],
                 preferred_element_type=jnp.float32)
    h2 = jnp.maximum(h2 + b2_ref[...], 0.0)

    # fc3 (out_features = 1): VPU multiply + XLU lane reduction instead of a
    # matmul with a single useful column.
    logit = jnp.sum(h2 * w3_ref[...], axis=-1, keepdims=True) + b3_ref[...]
    o_ref[...] = jax.nn.sigmoid(logit)


def _fused_forward_call(xd, wc, bc, w1r, b1, w2, b2, w3, b3, imgs):
    nblocks, rows, kp = xd.shape
    return pl.pallas_call(
        _fused_forward_kernel,
        out_shape=jax.ShapeDtypeStruct((nblocks, imgs, 1), jnp.float32),
        grid=(nblocks,),
        in_specs=[
            pl.BlockSpec((None, rows, kp), lambda i: (i, 0, 0)),
            # Grid-invariant, VMEM-resident weights/biases (< 1 MiB total).
            pl.BlockSpec(wc.shape, lambda i: (0, 0, 0)),
            pl.BlockSpec(bc.shape, lambda i: (0, 0)),
            pl.BlockSpec(w1r.shape, lambda i: (0, 0, 0)),
            pl.BlockSpec(b1.shape, lambda i: (0, 0)),
            pl.BlockSpec(w2.shape, lambda i: (0, 0)),
            pl.BlockSpec(b2.shape, lambda i: (0, 0)),
            pl.BlockSpec(w3.shape, lambda i: (0, 0)),
            pl.BlockSpec(b3.shape, lambda i: (0, 0)),
        ],
        out_specs=pl.BlockSpec((None, imgs, 1), lambda i: (i, 0, 0)),
        compiler_params=pltpu.CompilerParams(
            dimension_semantics=("parallel",)),
    )(xd, wc, bc, w1r, b1, w2, b2, w3, b3)


# ----------------------------------------------------------------------------
# Parameter construction (all layout work done ONCE here, not on the hot path).
# ----------------------------------------------------------------------------
def _lower_conv3x3_weights(conv_w, width, k_pad):
    """Lower [Cout,Cin,3,3] pad=1 conv weights to a block-Toeplitz matmul slab.

    Returns wc [3, k_pad, 2*(width//2)*Cout] bf16 such that
      (padded_row[y+di] @ wc[di])[:, u*Cout+co]          -> conv(x)[y, 2u,   co]
      (padded_row[y+di] @ wc[di])[:, lanes + u*Cout+co]  -> conv(x)[y, 2u+1, co]
    where padded_row[r] is the zero-padded input row r flattened as (W+2)*Cin.
    """
    cout, cin = conv_w.shape[0], conv_w.shape[1]
    wh = width // 2
    lanes = wh * cout
    cw = np.asarray(conv_w, dtype=np.float32)
    wc = np.zeros((3, k_pad, 2 * lanes), np.float32)
    for di in range(3):
        for dj in range(3):
            tap = cw[:, :, di, dj].T                       # [Cin, Cout]
            for u in range(wh):
                re = (2 * u + dj) * cin                    # even output col 2u
                ro = (2 * u + 1 + dj) * cin                # odd output col 2u+1
                wc[di, re:re + cin, u * cout:(u + 1) * cout] = tap
                wc[di, ro:ro + cin, lanes + u * cout:lanes + (u + 1) * cout] = tap
    return jnp.asarray(wc, jnp.bfloat16)


def init_params(key, cin=3, cout=32, hidden=128, spatial=16):
    ks = jax.random.split(key, 8)
    h = w = spatial
    hp, wp = h // 2, w // 2
    lanes = wp * cout
    k_pad = _round_up((w + 2) * cin, 128)   # lane-dense K for the conv matmuls

    conv_w = 0.1 * jax.random.normal(ks[0], (cout, cin, 3, 3), jnp.float32)
    conv_b = 0.1 * jax.random.normal(ks[1], (cout,), jnp.float32)
    # PyTorch-convention fc weights (y = x @ W.T + b), pre-laid-out once here.
    fc1_w = 0.05 * jax.random.normal(ks[2], (hidden, hp * lanes), jnp.float32)
    fc1_b = 0.05 * jax.random.normal(ks[3], (hidden,), jnp.float32)
    fc2_w = 0.05 * jax.random.normal(ks[4], (hidden, hidden), jnp.float32)
    fc2_b = 0.05 * jax.random.normal(ks[5], (hidden,), jnp.float32)
    fc3_w = 0.05 * jax.random.normal(ks[6], (1, hidden), jnp.float32)
    fc3_b = 0.05 * jax.random.normal(ks[7], (1,), jnp.float32)

    raw = dict(conv_w=conv_w, conv_b=conv_b, fc1_w=fc1_w, fc1_b=fc1_b,
               fc2_w=fc2_w, fc2_b=fc2_b, fc3_w=fc3_w, fc3_b=fc3_b)

    # TODO(synk): if real VGG/ResNet checkpoint weights were loaded, fc1
    # columns must be permuted from NCHW (c,h,w) flatten order to this
    # kernel's (h,w,c) feature order at init.
    w1r = jnp.transpose(fc1_w.reshape(hidden, hp, lanes), (1, 2, 0))

    params = {
        "conv_wc": _lower_conv3x3_weights(conv_w, w, k_pad),  # [3,Kp,2*lanes]
        "conv_bt": jnp.tile(conv_b, wp)[None, :],             # [1, lanes] f32
        "w1": w1r.astype(jnp.bfloat16),                       # [hp,lanes,hid]
        "b1": fc1_b[None, :],                                  # [1, hid] f32
        "w2": fc2_w.T.astype(jnp.bfloat16),                   # [hid, hid] bf16
        "b2": fc2_b[None, :],                                  # [1, hid] f32
        "w3": fc3_w,                                           # [1, hid] f32
        "b3": fc3_b[None, :],                                  # [1, 1]  f32
    }
    return params, raw


# ----------------------------------------------------------------------------
# Forward pass
# ----------------------------------------------------------------------------
def binary_classifier_forward(params, x, imgs_per_block=IMGS_PER_BLOCK):
    """x: [N, C, H, W] float32 (NCHW, like PyTorch) -> [N, 1] sigmoid probs."""
    n, cin, h, w = x.shape
    hp = h // 2
    kp = params["conv_wc"].shape[1]
    imgs = imgs_per_block
    n_pad = _round_up(max(n, 1), imgs)
    nblocks = n_pad // imgs

    # Input layout glue (done once, in bf16): NCHW -> padded NHWC rows ->
    # four shifted, 8-row-aligned row sets laid out (set, h, image) so every
    # in-kernel slice is contiguous and sublane-aligned.
    xp = jnp.pad(x, ((0, n_pad - n), (0, 0), (0, 0), (0, 0)))
    xn = jnp.transpose(xp, (0, 2, 3, 1))                       # NHWC
    xn = jnp.pad(xn, ((0, 0), (1, 1), (1, 1), (0, 0)))         # spatial pad=1
    xr = xn.reshape(n_pad, h + 2, (w + 2) * cin)
    xr = jnp.pad(xr, ((0, 0), (0, 0), (0, kp - (w + 2) * cin)))
    xr = xr.astype(jnp.bfloat16).reshape(nblocks, imgs, h + 2, kp)
    sets = jnp.stack([xr[:, :, r:r + 2 * hp:2, :] for r in range(4)], axis=1)
    xd = jnp.transpose(sets, (0, 1, 3, 2, 4)).reshape(nblocks, 4 * hp * imgs, kp)

    probs = _fused_forward_call(xd, params["conv_wc"], params["conv_bt"],
                                params["w1"], params["b1"], params["w2"],
                                params["b2"], params["w3"], params["b3"], imgs)
    return probs.reshape(n_pad, 1)[:n]


# ----------------------------------------------------------------------------
# Pure-JAX reference (f32) for correctness validation.
# ----------------------------------------------------------------------------
def _reference_forward(raw, x):
    y = jax.lax.conv_general_dilated(
        x, raw["conv_w"], window_strides=(1, 1), padding="SAME",
        dimension_numbers=("NCHW", "OIHW", "NCHW"))
    y = jax.nn.relu(y + raw["conv_b"][None, :, None, None])
    y = jax.lax.reduce_window(y, -jnp.inf, jax.lax.max,
                              (1, 1, 2, 2), (1, 1, 2, 2), "VALID")
    feat = jnp.transpose(y, (0, 2, 3, 1)).reshape(x.shape[0], -1)  # (h, w, c)
    h1 = jax.nn.relu(feat @ raw["fc1_w"].T + raw["fc1_b"])
    h2 = jax.nn.relu(h1 @ raw["fc2_w"].T + raw["fc2_b"])
    return jax.nn.sigmoid(h2 @ raw["fc3_w"].T + raw["fc3_b"])


if __name__ == "__main__":
    key = jax.random.PRNGKey(0)
    k_param, k_x = jax.random.split(key)

    # Small image batch consistent with an image classifier: NCHW.
    x = jax.random.normal(k_x, (2, 3, 16, 16), dtype=jnp.float32)
    params, raw = init_params(k_param, cin=3, cout=32, hidden=128, spatial=16)

    fwd = jax.jit(binary_classifier_forward)
    out = jax.block_until_ready(fwd(params, x))

    assert out.shape == (2, 1), out.shape
    assert bool(jnp.all((out > 0.0) & (out < 1.0))), "sigmoid output out of range"
    ref = _reference_forward(raw, x)
    assert bool(jnp.max(jnp.abs(out - ref)) < 5e-2), (out, ref)
    print("KERNEL_OK")
</pallas_src>

<mosaic_0001>
module attributes {stable_mosaic.version = 11 : i64} {
  func.func @_fused_forward_kernel(%arg0: i32, %arg1: memref<1x256x128xbf16, #tpu.memory_space<vmem>>, %arg2: memref<3x128x512xbf16, #tpu.memory_space<vmem>>, %arg3: memref<1x256xf32, #tpu.memory_space<vmem>>, %arg4: memref<8x256x128xbf16, #tpu.memory_space<vmem>>, %arg5: memref<1x128xf32, #tpu.memory_space<vmem>>, %arg6: memref<128x128xbf16, #tpu.memory_space<vmem>>, %arg7: memref<1x128xf32, #tpu.memory_space<vmem>>, %arg8: memref<1x128xf32, #tpu.memory_space<vmem>>, %arg9: memref<1x1xf32, #tpu.memory_space<vmem>>, %arg10: memref<1x8x1xf32, #tpu.memory_space<vmem>>) attributes {dimension_semantics = [#tpu.dimension_semantics<parallel>], iteration_bounds = array<i64: 1>, scalar_prefetch = 0 : i64, scratch_operands = 0 : i64, tpu.core_type = #tpu.core_type<tc>, window_params = [{transform_indices = @transform_0, window_bounds = array<i64: 1, 256, 128>}, {pipeline_mode = #tpu.pipeline_mode<synchronous>, transform_indices = @transform_1, window_bounds = array<i64: 3, 128, 512>}, {pipeline_mode = #tpu.pipeline_mode<synchronous>, transform_indices = @transform_2, window_bounds = array<i64: 1, 256>}, {pipeline_mode = #tpu.pipeline_mode<synchronous>, transform_indices = @transform_3, window_bounds = array<i64: 8, 256, 128>}, {pipeline_mode = #tpu.pipeline_mode<synchronous>, transform_indices = @transform_4, window_bounds = array<i64: 1, 128>}, {pipeline_mode = #tpu.pipeline_mode<synchronous>, transform_indices = @transform_5, window_bounds = array<i64: 128, 128>}, {pipeline_mode = #tpu.pipeline_mode<synchronous>, transform_indices = @transform_6, window_bounds = array<i64: 1, 128>}, {pipeline_mode = #tpu.pipeline_mode<synchronous>, transform_indices = @transform_7, window_bounds = array<i64: 1, 128>}, {pipeline_mode = #tpu.pipeline_mode<synchronous>, transform_indices = @transform_8, window_bounds = array<i64: 1, 1>}, {transform_indices = @transform_9, window_bounds = array<i64: 1, 8, 1>}]} {
    %c0 = arith.constant 0 : index
    %c0_0 = arith.constant 0 : index
    %c0_1 = arith.constant 0 : index
    %0 = vector.load %arg1[%c0, %c0_0, %c0_1] : memref<1x256x128xbf16, #tpu.memory_space<vmem>>, vector<1x128x128xbf16>
    %1 = vector.shape_cast %0 : vector<1x128x128xbf16> to vector<128x128xbf16>
    %c0_2 = arith.constant 0 : index
    %c0_3 = arith.constant 0 : index
    %c0_4 = arith.constant 0 : index
    %2 = vector.load %arg2[%c0_2, %c0_3, %c0_4] : memref<3x128x512xbf16, #tpu.memory_space<vmem>>, vector<1x128x512xbf16>
    %3 = vector.shape_cast %2 : vector<1x128x512xbf16> to vector<128x512xbf16>
    %cst = arith.constant dense<0.000000e+00> : vector<128x512xf32>
    %4 = tpu.matmul %1, %3, %cst {dimension_numbers = #tpu.dot_dimension_numbers<[1], [0], [0], [1], [0, 0, 1, 1], [], []>} : vector<128x128xbf16>, vector<128x512xbf16>, vector<128x512xf32> -> vector<128x512xf32>
    %c0_5 = arith.constant 0 : index
    %c64 = arith.constant 64 : index
    %c0_6 = arith.constant 0 : index
    %5 = vector.load %arg1[%c0_5, %c64, %c0_6] : memref<1x256x128xbf16, #tpu.memory_space<vmem>>, vector<1x128x128xbf16>
    %6 = vector.shape_cast %5 : vector<1x128x128xbf16> to vector<128x128xbf16>
    %c1 = arith.constant 1 : index
    %c0_7 = arith.constant 0 : index
    %c0_8 = arith.constant 0 : index
    %7 = vector.load %arg2[%c1, %c0_7, %c0_8] : memref<3x128x512xbf16, #tpu.memory_space<vmem>>, vector<1x128x512xbf16>
    %8 = vector.shape_cast %7 : vector<1x128x512xbf16> to vector<128x512xbf16>
    %cst_9 = arith.constant dense<0.000000e+00> : vector<128x512xf32>
    %9 = tpu.matmul %6, %8, %cst_9 {dimension_numbers = #tpu.dot_dimension_numbers<[1], [0], [0], [1], [0, 0, 1, 1], [], []>} : vector<128x128xbf16>, vector<128x512xbf16>, vector<128x512xf32> -> vector<128x512xf32>
    %10 = arith.addf %4, %9 : vector<128x512xf32>
    %c0_10 = arith.constant 0 : index
    %c128 = arith.constant 128 : index
    %c0_11 = arith.constant 0 : index
    %11 = vector.load %arg1[%c0_10, %c128, %c0_11] : memref<1x256x128xbf16, #tpu.memory_space<vmem>>, vector<1x128x128xbf16>
    %12 = vector.shape_cast %11 : vector<1x128x128xbf16> to vector<128x128xbf16>
    %c2 = arith.constant 2 : index
    %c0_12 = arith.constant 0 : index
    %c0_13 = arith.constant 0 : index
    %13 = vector.load %arg2[%c2, %c0_12, %c0_13] : memref<3x128x512xbf16, #tpu.memory_space<vmem>>, vector<1x128x512xbf16>
    %14 = vector.shape_cast %13 : vector<1x128x512xbf16> to vector<128x512xbf16>
    %cst_14 = arith.constant dense<0.000000e+00> : vector<128x512xf32>
    %15 = tpu.matmul %12, %14, %cst_14 {dimension_numbers = #tpu.dot_dimension_numbers<[1], [0], [0], [1], [0, 0, 1, 1], [], []>} : vector<128x128xbf16>, vector<128x512xbf16>, vector<128x512xf32> -> vector<128x512xf32>
    %16 = arith.addf %10, %15 : vector<128x512xf32>
    %17 = vector.extract_strided_slice %16 {offsets = [0, 0], sizes = [64, 256], strides = [1, 1]} : vector<128x512xf32> to vector<64x256xf32>
    %18 = vector.extract_strided_slice %16 {offsets = [0, 256], sizes = [64, 256], strides = [1, 1]} : vector<128x512xf32> to vector<64x256xf32>
    %19 = vector.extract_strided_slice %16 {offsets = [64, 0], sizes = [64, 256], strides = [1, 1]} : vector<128x512xf32> to vector<64x256xf32>
    %20 = vector.extract_strided_slice %16 {offsets = [64, 256], sizes = [64, 256], strides = [1, 1]} : vector<128x512xf32> to vector<64x256xf32>
    %21 = arith.maximumf %17, %18 : vector<64x256xf32>
    %22 = arith.maximumf %19, %20 : vector<64x256xf32>
    %23 = arith.maximumf %21, %22 : vector<64x256xf32>
    %c0_15 = arith.constant 0 : index
    %c0_16 = arith.constant 0 : index
    %24 = vector.load %arg3[%c0_15, %c0_16] : memref<1x256xf32, #tpu.memory_space<vmem>>, vector<1x256xf32>
    %25 = vector.broadcast %24 : vector<1x256xf32> to vector<64x256xf32>
    %26 = arith.addf %23, %25 : vector<64x256xf32>
    %cst_17 = arith.constant 0.000000e+00 : f32
    %27 = vector.broadcast %cst_17 : f32 to vector<64x256xf32>
    %28 = arith.maximumf %26, %27 : vector<64x256xf32>
    %cst_18 = arith.constant 0.000000e+00 : f32
    %29 = vector.broadcast %cst_18 : f32 to vector<8x128xf32>
    %30 = vector.extract_strided_slice %28 {offsets = [0, 0], sizes = [8, 256], strides = [1, 1]} : vector<64x256xf32> to vector<8x256xf32>
    %31 = arith.truncf %30 : vector<8x256xf32> to vector<8x256xbf16>
    %c0_19 = arith.constant 0 : index
    %c0_20 = arith.constant 0 : index
    %c0_21 = arith.constant 0 : index
    %32 = vector.load %arg4[%c0_19, %c0_20, %c0_21] : memref<8x256x128xbf16, #tpu.memory_space<vmem>>, vector<1x256x128xbf16>
    %33 = vector.shape_cast %32 : vector<1x256x128xbf16> to vector<256x128xbf16>
    %cst_22 = arith.constant dense<0.000000e+00> : vector<8x128xf32>
    %34 = tpu.matmul %31, %33, %cst_22 {dimension_numbers = #tpu.dot_dimension_numbers<[1], [0], [0], [1], [0, 0, 1, 1], [], []>} : vector<8x256xbf16>, vector<256x128xbf16>, vector<8x128xf32> -> vector<8x128xf32>
    %35 = arith.addf %29, %34 : vector<8x128xf32>
    %36 = vector.extract_strided_slice %28 {offsets = [8, 0], sizes = [8, 256], strides = [1, 1]} : vector<64x256xf32> to vector<8x256xf32>
    %37 = arith.truncf %36 : vector<8x256xf32> to vector<8x256xbf16>
    %c1_23 = arith.constant 1 : index
    %c0_24 = arith.constant 0 : index
    %c0_25 = arith.constant 0 : index
    %38 = vector.load %arg4[%c1_23, %c0_24, %c0_25] : memref<8x256x128xbf16, #tpu.memory_space<vmem>>, vector<1x256x128xbf16>
    %39 = vector.shape_cast %38 : vector<1x256x128xbf16> to vector<256x128xbf16>
    %cst_26 = arith.constant dense<0.000000e+00> : vector<8x128xf32>
    %40 = tpu.matmul %37, %39, %cst_26 {dimension_numbers = #tpu.dot_dimension_numbers<[1], [0], [0], [1], [0, 0, 1, 1], [], []>} : vector<8x256xbf16>, vector<256x128xbf16>, vector<8x128xf32> -> vector<8x128xf32>
    %41 = arith.addf %35, %40 : vector<8x128xf32>
    %42 = vector.extract_strided_slice %28 {offsets = [16, 0], sizes = [8, 256], strides = [1, 1]} : vector<64x256xf32> to vector<8x256xf32>
    %43 = arith.truncf %42 : vector<8x256xf32> to vector<8x256xbf16>
    %c2_27 = arith.constant 2 : index
    %c0_28 = arith.constant 0 : index
    %c0_29 = arith.constant 0 : index
    %44 = vector.load %arg4[%c2_27, %c0_28, %c0_29] : memref<8x256x128xbf16, #tpu.memory_space<vmem>>, vector<1x256x128xbf16>
    %45 = vector.shape_cast %44 : vector<1x256x128xbf16> to vector<256x128xbf16>
    %cst_30 = arith.constant dense<0.000000e+00> : vector<8x128xf32>
    %46 = tpu.matmul %43, %45, %cst_30 {dimension_numbers = #tpu.dot_dimension_numbers<[1], [0], [0], [1], [0, 0, 1, 1], [], []>} : vector<8x256xbf16>, vector<256x128xbf16>, vector<8x128xf32> -> vector<8x128xf32>
    %47 = arith.addf %41, %46 : vector<8x128xf32>
    %48 = vector.extract_strided_slice %28 {offsets = [24, 0], sizes = [8, 256], strides = [1, 1]} : vector<64x256xf32> to vector<8x256xf32>
    %49 = arith.truncf %48 : vector<8x256xf32> to vector<8x256xbf16>
    %c3 = arith.constant 3 : index
    %c0_31 = arith.constant 0 : index
    %c0_32 = arith.constant 0 : index
    %50 = vector.load %arg4[%c3, %c0_31, %c0_32] : memref<8x256x128xbf16, #tpu.memory_space<vmem>>, vector<1x256x128xbf16>
    %51 = vector.shape_cast %50 : vector<1x256x128xbf16> to vector<256x128xbf16>
    %cst_33 = arith.constant dense<0.000000e+00> : vector<8x128xf32>
    %52 = tpu.matmul %49, %51, %cst_33 {dimension_numbers = #tpu.dot_dimension_numbers<[1], [0], [0], [1], [0, 0, 1, 1], [], []>} : vector<8x256xbf16>, vector<256x128xbf16>, vector<8x128xf32> -> vector<8x128xf32>
    %53 = arith.addf %47, %52 : vector<8x128xf32>
    %54 = vector.extract_strided_slice %28 {offsets = [32, 0], sizes = [8, 256], strides = [1, 1]} : vector<64x256xf32> to vector<8x256xf32>
    %55 = arith.truncf %54 : vector<8x256xf32> to vector<8x256xbf16>
    %c4 = arith.constant 4 : index
    %c0_34 = arith.constant 0 : index
    %c0_35 = arith.constant 0 : index
    %56 = vector.load %arg4[%c4, %c0_34, %c0_35] : memref<8x256x128xbf16, #tpu.memory_space<vmem>>, vector<1x256x128xbf16>
    %57 = vector.shape_cast %56 : vector<1x256x128xbf16> to vector<256x128xbf16>
    %cst_36 = arith.constant dense<0.000000e+00> : vector<8x128xf32>
    %58 = tpu.matmul %55, %57, %cst_36 {dimension_numbers = #tpu.dot_dimension_numbers<[1], [0], [0], [1], [0, 0, 1, 1], [], []>} : vector<8x256xbf16>, vector<256x128xbf16>, vector<8x128xf32> -> vector<8x128xf32>
    %59 = arith.addf %53, %58 : vector<8x128xf32>
    %60 = vector.extract_strided_slice %28 {offsets = [40, 0], sizes = [8, 256], strides = [1, 1]} : vector<64x256xf32> to vector<8x256xf32>
    %61 = arith.truncf %60 : vector<8x256xf32> to vector<8x256xbf16>
    %c5 = arith.constant 5 : index
    %c0_37 = arith.constant 0 : index
    %c0_38 = arith.constant 0 : index
    %62 = vector.load %arg4[%c5, %c0_37, %c0_38] : memref<8x256x128xbf16, #tpu.memory_space<vmem>>, vector<1x256x128xbf16>
    %63 = vector.shape_cast %62 : vector<1x256x128xbf16> to vector<256x128xbf16>
    %cst_39 = arith.constant dense<0.000000e+00> : vector<8x128xf32>
    %64 = tpu.matmul %61, %63, %cst_39 {dimension_numbers = #tpu.dot_dimension_numbers<[1], [0], [0], [1], [0, 0, 1, 1], [], []>} : vector<8x256xbf16>, vector<256x128xbf16>, vector<8x128xf32> -> vector<8x128xf32>
    %65 = arith.addf %59, %64 : vector<8x128xf32>
    %66 = vector.extract_strided_slice %28 {offsets = [48, 0], sizes = [8, 256], strides = [1, 1]} : vector<64x256xf32> to vector<8x256xf32>
    %67 = arith.truncf %66 : vector<8x256xf32> to vector<8x256xbf16>
    %c6 = arith.constant 6 : index
    %c0_40 = arith.constant 0 : index
    %c0_41 = arith.constant 0 : index
    %68 = vector.load %arg4[%c6, %c0_40, %c0_41] : memref<8x256x128xbf16, #tpu.memory_space<vmem>>, vector<1x256x128xbf16>
    %69 = vector.shape_cast %68 : vector<1x256x128xbf16> to vector<256x128xbf16>
    %cst_42 = arith.constant dense<0.000000e+00> : vector<8x128xf32>
    %70 = tpu.matmul %67, %69, %cst_42 {dimension_numbers = #tpu.dot_dimension_numbers<[1], [0], [0], [1], [0, 0, 1, 1], [], []>} : vector<8x256xbf16>, vector<256x128xbf16>, vector<8x128xf32> -> vector<8x128xf32>
    %71 = arith.addf %65, %70 : vector<8x128xf32>
    %72 = vector.extract_strided_slice %28 {offsets = [56, 0], sizes = [8, 256], strides = [1, 1]} : vector<64x256xf32> to vector<8x256xf32>
    %73 = arith.truncf %72 : vector<8x256xf32> to vector<8x256xbf16>
    %c7 = arith.constant 7 : index
    %c0_43 = arith.constant 0 : index
    %c0_44 = arith.constant 0 : index
    %74 = vector.load %arg4[%c7, %c0_43, %c0_44] : memref<8x256x128xbf16, #tpu.memory_space<vmem>>, vector<1x256x128xbf16>
    %75 = vector.shape_cast %74 : vector<1x256x128xbf16> to vector<256x128xbf16>
    %cst_45 = arith.constant dense<0.000000e+00> : vector<8x128xf32>
    %76 = tpu.matmul %73, %75, %cst_45 {dimension_numbers = #tpu.dot_dimension_numbers<[1], [0], [0], [1], [0, 0, 1, 1], [], []>} : vector<8x256xbf16>, vector<256x128xbf16>, vector<8x128xf32> -> vector<8x128xf32>
    %77 = arith.addf %71, %76 : vector<8x128xf32>
    %c0_46 = arith.constant 0 : index
    %c0_47 = arith.constant 0 : index
    %78 = vector.load %arg5[%c0_46, %c0_47] : memref<1x128xf32, #tpu.memory_space<vmem>>, vector<1x128xf32>
    %79 = vector.broadcast %78 : vector<1x128xf32> to vector<8x128xf32>
    %80 = arith.addf %77, %79 : vector<8x128xf32>
    %cst_48 = arith.constant 0.000000e+00 : f32
    %81 = vector.broadcast %cst_48 : f32 to vector<8x128xf32>
    %82 = arith.maximumf %80, %81 : vector<8x128xf32>
    %83 = arith.truncf %82 : vector<8x128xf32> to vector<8x128xbf16>
    %c0_49 = arith.constant 0 : index
    %c0_50 = arith.constant 0 : index
    %84 = vector.load %arg6[%c0_49, %c0_50] : memref<128x128xbf16, #tpu.memory_space<vmem>>, vector<128x128xbf16>
    %cst_51 = arith.constant dense<0.000000e+00> : vector<8x128xf32>
    %85 = tpu.matmul %83, %84, %cst_51 {dimension_numbers = #tpu.dot_dimension_numbers<[1], [0], [0], [1], [0, 0, 1, 1], [], []>} : vector<8x128xbf16>, vector<128x128xbf16>, vector<8x128xf32> -> vector<8x128xf32>
    %c0_52 = arith.constant 0 : index
    %c0_53 = arith.constant 0 : index
    %86 = vector.load %arg7[%c0_52, %c0_53] : memref<1x128xf32, #tpu.memory_space<vmem>>, vector<1x128xf32>
    %87 = vector.broadcast %86 : vector<1x128xf32> to vector<8x128xf32>
    %88 = arith.addf %85, %87 : vector<8x128xf32>
    %cst_54 = arith.constant 0.000000e+00 : f32
    %89 = vector.broadcast %cst_54 : f32 to vector<8x128xf32>
    %90 = arith.maximumf %88, %89 : vector<8x128xf32>
    %c0_55 = arith.constant 0 : index
    %c0_56 = arith.constant 0 : index
    %91 = vector.load %arg8[%c0_55, %c0_56] : memref<1x128xf32, #tpu.memory_space<vmem>>, vector<1x128xf32>
    %92 = vector.broadcast %91 : vector<1x128xf32> to vector<8x128xf32>
    %93 = arith.mulf %90, %92 : vector<8x128xf32>
    %cst_57 = arith.constant dense<0.000000e+00> : vector<8xf32>
    %94 = vector.multi_reduction <add>, %93, %cst_57 [1] : vector<8x128xf32> to vector<8xf32>
    %95 = vector.shape_cast %94 : vector<8xf32> to vector<8x1xf32>
    %c0_58 = arith.constant 0 : index
    %c0_59 = arith.constant 0 : index
    %96 = vector.load %arg9[%c0_58, %c0_59] : memref<1x1xf32, #tpu.memory_space<vmem>>, vector<1x1xf32>
    %97 = vector.broadcast %96 : vector<1x1xf32> to vector<8x1xf32>
    %98 = arith.addf %95, %97 : vector<8x1xf32>
    %99 = arith.negf %98 : vector<8x1xf32>
    %100 = math.exp %99 : vector<8x1xf32>
    %cst_60 = arith.constant 1.000000e+00 : f32
    %101 = vector.broadcast %cst_60 : f32 to vector<8x1xf32>
    %102 = arith.addf %101, %100 : vector<8x1xf32>
    %103 = arith.divf %101, %102 : vector<8x1xf32>
    %c0_61 = arith.constant 0 : index
    %c0_62 = arith.constant 0 : index
    %c0_63 = arith.constant 0 : index
    %104 = vector.load %arg10[%c0_61, %c0_62, %c0_63] : memref<1x8x1xf32, #tpu.memory_space<vmem>>, vector<1x8x1xf32>
    %105 = vector.shape_cast %104 : vector<1x8x1xf32> to vector<8x1xf32>
    %106 = vector.shape_cast %103 : vector<8x1xf32> to vector<1x8x1xf32>
    tpu.vector_store %arg10[%c0_61, %c0_62, %c0_63], %106 {strides = array<i32>} : memref<1x8x1xf32, #tpu.memory_space<vmem>>, vector<1x8x1xf32>,
    return
  }
  func.func @transform_0(%arg0: i32) -> (i32, i32, i32) {
    %c0_i32 = arith.constant 0 : i32
    %c0_i32_0 = arith.constant 0 : i32
    %c0_i32_1 = arith.constant 0 : i32
    return %arg0, %c0_i32, %c0_i32_0 : i32, i32, i32
  }
  func.func @transform_1(%arg0: i32) -> (i32, i32, i32) {
    %c0_i32 = arith.constant 0 : i32
    %c0_i32_0 = arith.constant 0 : i32
    %c0_i32_1 = arith.constant 0 : i32
    %c0_i32_2 = arith.constant 0 : i32
    return %c0_i32, %c0_i32_0, %c0_i32_1 : i32, i32, i32
  }
  func.func @transform_2(%arg0: i32) -> (i32, i32) {
    %c0_i32 = arith.constant 0 : i32
    %c0_i32_0 = arith.constant 0 : i32
    %c0_i32_1 = arith.constant 0 : i32
    return %c0_i32, %c0_i32_0 : i32, i32
  }
  func.func @transform_3(%arg0: i32) -> (i32, i32, i32) {
    %c0_i32 = arith.constant 0 : i32
    %c0_i32_0 = arith.constant 0 : i32
    %c0_i32_1 = arith.constant 0 : i32
    %c0_i32_2 = arith.constant 0 : i32
    return %c0_i32, %c0_i32_0, %c0_i32_1 : i32, i32, i32
  }
  func.func @transform_4(%arg0: i32) -> (i32, i32) {
    %c0_i32 = arith.constant 0 : i32
    %c0_i32_0 = arith.constant 0 : i32
    %c0_i32_1 = arith.constant 0 : i32
    return %c0_i32, %c0_i32_0 : i32, i32
  }
  func.func @transform_5(%arg0: i32) -> (i32, i32) {
    %c0_i32 = arith.constant 0 : i32
    %c0_i32_0 = arith.constant 0 : i32
    %c0_i32_1 = arith.constant 0 : i32
    return %c0_i32, %c0_i32_0 : i32, i32
  }
  func.func @transform_6(%arg0: i32) -> (i32, i32) {
    %c0_i32 = arith.constant 0 : i32
    %c0_i32_0 = arith.constant 0 : i32
    %c0_i32_1 = arith.constant 0 : i32
    return %c0_i32, %c0_i32_0 : i32, i32
  }
  func.func @transform_7(%arg0: i32) -> (i32, i32) {
    %c0_i32 = arith.constant 0 : i32
    %c0_i32_0 = arith.constant 0 : i32
    %c0_i32_1 = arith.constant 0 : i32
    return %c0_i32, %c0_i32_0 : i32, i32
  }
  func.func @transform_8(%arg0: i32) -> (i32, i32) {
    %c0_i32 = arith.constant 0 : i32
    %c0_i32_0 = arith.constant 0 : i32
    %c0_i32_1 = arith.constant 0 : i32
    return %c0_i32, %c0_i32_0 : i32, i32
  }
  func.func @transform_9(%arg0: i32) -> (i32, i32, i32) {
    %c0_i32 = arith.constant 0 : i32
    %c0_i32_0 = arith.constant 0 : i32
    %c0_i32_1 = arith.constant 0 : i32
    return %arg0, %c0_i32, %c0_i32_0 : i32, i32, i32
  }
}

</mosaic_0001>

<bundles_post_ra>
// kernel: binary_classifier_forward.1
= control target key start
LH: loop header
LB: loop body
LE: loop exit
PB: predicated region body
PF: predicated region fallthrough
CT: control target
= control target key end

     0   :  { %vm2891_vm3 = vcmask 7168   ;;  %s6160_s1 = inlined_call_operand.vmem [shape: bf16[3,128,512], index: 1, kind: input, shape index: {}]   ;;  %s6161_s0 = inlined_call_operand.vmem [shape: bf16[1,256,128], index: 0, kind: input, shape index: {}]   ;;  %s6162_s3 = inlined_call_operand.vmem [shape: bf16[8,256,128], index: 3, kind: input, shape index: {}]   ;;  %s6163_s2 = inlined_call_operand.vmem [shape: f32[1,256], index: 2, kind: input, shape index: {}]   ;;  %s6164_s4 = inlined_call_operand.vmem [shape: f32[1,128], index: 4, kind: input, shape index: {}]   ;;  %s6165_s6 = inlined_call_operand.vmem [shape: f32[1,128], index: 6, kind: input, shape index: {}]   ;;  %s6166_s5 = inlined_call_operand.vmem [shape: bf16[128,128], index: 5, kind: input, shape index: {}]   ;;  %s6167_s7 = inlined_call_operand.vmem [shape: f32[1,128], index: 7, kind: input, shape index: {}]   ;;  %s6168_s8 = inlined_call_operand.<no memory space> [shape: f32[1,1], index: 8, kind: input, shape index: {}]   ;;  %s6169_s9 = inlined_call_operand.vmem [shape: f32[1,8,1], index: 9, kind: output, shape index: {}]  }
   0x1   :  { %v3075_v0 = vld [vmem:[%s6160_s1 + $0x1e0] sm:$0xf]  ;;  %v4268_v1 = vld [vmem:[%s6160_s1 + $0x1ec] sm:$0xf0]  ;;  %v4266_v2 = vld [vmem:[%s6160_s1 + $0x1e4] sm:$0xf] }
   0x2   :  { %v3076_v3 = vor.u32 %v4268_v1, %v3075_v0  ;;  %v3077_v4 = vld [vmem:[%s6160_s1 + $0x1f0] sm:$0xf0]  ;;  %v3083_v5 = vld [vmem:[%s6160_s1 + $0x1e8] sm:$0xf]  ;;  %v4269_v6 = vld [vmem:[%s6160_s1 + $0x1f4] sm:$0xf0] }
   0x3   :  { %v3080_v7 = vor.u32 %v4266_v2, %v3077_v4  ;;  %v3084_v8 = vor.u32 %v4269_v6, %v3083_v5  ;;  %v4267_v9 = vld [vmem:[%s6160_s1 + $0x1ec] sm:$0xf]  ;;  %v3085_v10 = vld [vmem:[%s6160_s1 + $0x1f8] sm:$0xf0]  ;;  %v3059_v11 = vld [vmem:[%s6160_s1 + $0x1c0] sm:$0xf] }
   0x4   :  { %331 = vmatpush.bf16.msra.mxu0 %v3076_v3  ;;  %v3088_v12 = vor.u32 %v4267_v9, %v3085_v10  ;;  %v4264_v13 = vld [vmem:[%s6160_s1 + $0x1cc] sm:$0xf0]  ;;  %v4262_v14 = vld [vmem:[%s6160_s1 + $0x1c4] sm:$0xf]  ;;  %v3061_v15 = vld [vmem:[%s6160_s1 + $0x1d0] sm:$0xf0] }
   0x5   :  { %380 = vmatpush.bf16.msra.mxu1 %v3080_v7  ;;  %429 = vmatpush.bf16.msra.mxu2 %v3084_v8  ;;  %v3060_v16 = vor.u32 %v4264_v13, %v3059_v11  ;;  %v3064_v17 = vor.u32 %v4262_v14, %v3061_v15  ;;  %v3067_v18 = vld [vmem:[%s6160_s1 + $0x1c8] sm:$0xf]  ;;  %v4265_v19 = vld [vmem:[%s6160_s1 + $0x1d4] sm:$0xf0]  ;;  %v4263_v20 = vld [vmem:[%s6160_s1 + $0x1cc] sm:$0xf] }
   0x6   :  { %478 = vmatpush.bf16.msra.mxu3 %v3088_v12  ;;  %v3068_v21 = vor.u32 %v4265_v19, %v3067_v18  ;;  %v3069_v22 = vld [vmem:[%s6160_s1 + $0x1d8] sm:$0xf0]  ;;  %v3043_v23 = vld [vmem:[%s6160_s1 + $0x1a0] sm:$0xf]  ;;  %v4260_v24 = vld [vmem:[%s6160_s1 + $0x1ac] sm:$0xf0] }
   0x7   :  { %v3072_v25 = vor.u32 %v4263_v20, %v3069_v22  ;;  %v4258_v26 = vld [vmem:[%s6160_s1 + $0x1a4] sm:$0xf]  ;;  %v3045_v27 = vld [vmem:[%s6160_s1 + $0x1b0] sm:$0xf0]  ;;  %v3051_v28 = vld [vmem:[%s6160_s1 + $0x1a8] sm:$0xf]  ;;  %v3044_v29 = vor.u32 %v4260_v24, %v3043_v23 }
   0x8   :  { %332 = vmatpush.bf16.msra.mxu0 %v3060_v16  ;;  %v4261_v30 = vld [vmem:[%s6160_s1 + $0x1b4] sm:$0xf0]  ;;  %v4259_v31 = vld [vmem:[%s6160_s1 + $0x1ac] sm:$0xf]  ;;  %v3053_v32 = vld [vmem:[%s6160_s1 + $0x1b8] sm:$0xf0]  ;;  %v3048_v33 = vor.u32 %v4258_v26, %v3045_v27 }
   0x9   :  { %381 = vmatpush.bf16.msra.mxu1 %v3064_v17  ;;  %430 = vmatpush.bf16.msra.mxu2 %v3068_v21  ;;  %v3052_v34 = vor.u32 %v4261_v30, %v3051_v28  ;;  %v3027_v35 = vld [vmem:[%s6160_s1 + $0x180] sm:$0xf]  ;;  %v4256_v36 = vld [vmem:[%s6160_s1 + $0x18c] sm:$0xf0]  ;;  %v4254_v37 = vld [vmem:[%s6160_s1 + $0x184] sm:$0xf]  ;;  %v3056_v38 = vor.u32 %v4259_v31, %v3053_v32 }
   0xa   :  { %479 = vmatpush.bf16.msra.mxu3 %v3072_v25  ;;  %v3029_v39 = vld [vmem:[%s6160_s1 + $0x190] sm:$0xf0]  ;;  %v3035_v40 = vld [vmem:[%s6160_s1 + $0x188] sm:$0xf]  ;;  %v4257_v41 = vld [vmem:[%s6160_s1 + $0x194] sm:$0xf0]  ;;  %v3028_v44 = vor.u32 %v4256_v36, %v3027_v35 }
   0xb   :  { %v4255_v42 = vld [vmem:[%s6160_s1 + $0x18c] sm:$0xf]  ;;  %v3037_v43 = vld [vmem:[%s6160_s1 + $0x198] sm:$0xf0]  ;;  %v3032_v45 = vor.u32 %v4254_v37, %v3029_v39  ;;  %v3036_v46 = vor.u32 %v4257_v41, %v3035_v40  ;;  %v3011_v47 = vld [vmem:[%s6160_s1 + $0x160] sm:$0xf] }
   0xc   :  { %333 = vmatpush.bf16.msra.mxu0 %v3044_v29  ;;  %v4252_v48 = vld [vmem:[%s6160_s1 + $0x16c] sm:$0xf0]  ;;  %v4250_v49 = vld [vmem:[%s6160_s1 + $0x164] sm:$0xf]  ;;  %v3040_v50 = vor.u32 %v4255_v42, %v3037_v43  ;;  %v3013_v51 = vld [vmem:[%s6160_s1 + $0x170] sm:$0xf0] }
   0xd   :  { %382 = vmatpush.bf16.msra.mxu1 %v3048_v33  ;;  %431 = vmatpush.bf16.msra.mxu2 %v3052_v34  ;;  %v3019_v52 = vld [vmem:[%s6160_s1 + $0x168] sm:$0xf]  ;;  %v4253_v53 = vld [vmem:[%s6160_s1 + $0x174] sm:$0xf0]  ;;  %v4251_v54 = vld [vmem:[%s6160_s1 + $0x16c] sm:$0xf]  ;;  %v3012_v56 = vor.u32 %v4252_v48, %v3011_v47  ;;  %v3016_v57 = vor.u32 %v4250_v49, %v3013_v51 }
   0xe   :  { %480 = vmatpush.bf16.msra.mxu3 %v3056_v38  ;;  %v3021_v55 = vld [vmem:[%s6160_s1 + $0x178] sm:$0xf0]  ;;  %v3020_v58 = vor.u32 %v4253_v53, %v3019_v52  ;;  %v2995_v59 = vld [vmem:[%s6160_s1 + $0x140] sm:$0xf]  ;;  %v4248_v60 = vld [vmem:[%s6160_s1 + $0x14c] sm:$0xf0] }
   0xf   :  { %v4246_v61 = vld [vmem:[%s6160_s1 + $0x144] sm:$0xf]  ;;  %v3024_v62 = vor.u32 %v4251_v54, %v3021_v55  ;;  %v2997_v63 = vld [vmem:[%s6160_s1 + $0x150] sm:$0xf0]  ;;  %v3003_v0 = vld [vmem:[%s6160_s1 + $0x148] sm:$0xf]  ;;  %v2996_v4 = vor.u32 %v4248_v60, %v2995_v59 }
  0x10   :  { %334 = vmatpush.bf16.msra.mxu0 %v3028_v44  ;;  %v4249_v1 = vld [vmem:[%s6160_s1 + $0x154] sm:$0xf0]  ;;  %v4247_v2 = vld [vmem:[%s6160_s1 + $0x14c] sm:$0xf]  ;;  %v3005_v3 = vld [vmem:[%s6160_s1 + $0x158] sm:$0xf0]  ;;  %v3000_v5 = vor.u32 %v4246_v61, %v2997_v63 }
  0x11   :  { %383 = vmatpush.bf16.msra.mxu1 %v3032_v45  ;;  %432 = vmatpush.bf16.msra.mxu2 %v3036_v46  ;;  %v3004_v6 = vor.u32 %v4249_v1, %v3003_v0  ;;  %v2979_v7 = vld [vmem:[%s6160_s1 + $0x120] sm:$0xf]  ;;  %v4244_v8 = vld [vmem:[%s6160_s1 + $0x12c] sm:$0xf0]  ;;  %v4242_v9 = vld [vmem:[%s6160_s1 + $0x124] sm:$0xf]  ;;  %v3008_v10 = vor.u32 %v4247_v2, %v3005_v3 }
  0x12   :  { %481 = vmatpush.bf16.msra.mxu3 %v3040_v50  ;;  %v2981_v11 = vld [vmem:[%s6160_s1 + $0x130] sm:$0xf0]  ;;  %v2987_v12 = vld [vmem:[%s6160_s1 + $0x128] sm:$0xf]  ;;  %v4245_v13 = vld [vmem:[%s6160_s1 + $0x134] sm:$0xf0]  ;;  %v2980_v16 = vor.u32 %v4244_v8, %v2979_v7 }
  0x13   :  { %v4243_v14 = vld [vmem:[%s6160_s1 + $0x12c] sm:$0xf]  ;;  %v2989_v15 = vld [vmem:[%s6160_s1 + $0x138] sm:$0xf0]  ;;  %v2963_v17 = vld [vmem:[%s6160_s1 + $0x100] sm:$0xf]  ;;  %v2984_v18 = vor.u32 %v4242_v9, %v2981_v11  ;;  %v2988_v19 = vor.u32 %v4245_v13, %v2987_v12 }
  0x14   :  { %335 = vmatpush.bf16.msra.mxu0 %v3012_v56  ;;  %v4240_v20 = vld [vmem:[%s6160_s1 + $0x10c] sm:$0xf0]  ;;  %v4238_v21 = vld [vmem:[%s6160_s1 + $0x104] sm:$0xf]  ;;  %v2965_v22 = vld [vmem:[%s6160_s1 + $0x110] sm:$0xf0]  ;;  %v2992_v23 = vor.u32 %v4243_v14, %v2989_v15 }
  0x15   :  { %384 = vmatpush.bf16.msra.mxu1 %v3016_v57  ;;  %433 = vmatpush.bf16.msra.mxu2 %v3020_v58  ;;  %v2971_v24 = vld [vmem:[%s6160_s1 + $0x108] sm:$0xf]  ;;  %v4241_v25 = vld [vmem:[%s6160_s1 + $0x114] sm:$0xf0]  ;;  %v4239_v26 = vld [vmem:[%s6160_s1 + $0x10c] sm:$0xf]  ;;  %v2964_v30 = vor.u32 %v4240_v20, %v2963_v17  ;;  %v2968_v33 = vor.u32 %v4238_v21, %v2965_v22 }
  0x16   :  { %482 = vmatpush.bf16.msra.mxu3 %v3024_v62  ;;  %v2973_v27 = vld [vmem:[%s6160_s1 + $0x118] sm:$0xf0]  ;;  %v3227_v28 = vld [vmem:[%s6160_s1 + $0xe8] sm:$0xf]  ;;  %v4233_v29 = vld [vmem:[%s6160_s1 + $0xf4] sm:$0xf0]  ;;  %v2972_v34 = vor.u32 %v4241_v25, %v2971_v24 }
  0x17   :  { %v4231_v31 = vld [vmem:[%s6160_s1 + $0xec] sm:$0xf]  ;;  %v3229_v32 = vld [vmem:[%s6160_s1 + $0xf8] sm:$0xf0]  ;;  %v4711_v35 = vld [vmem:[%s6161_s0 + $0x20] sm:$0xff]  ;;  %v2976_v36 = vor.u32 %v4239_v26, %v2973_v27  ;;  %v3228_v37 = vor.u32 %v4233_v29, %v3227_v28 }
  0x18   :  { %336 = vmatpush.bf16.msra.mxu0 %v2996_v4  ;;  %v3219_v38 = vld [vmem:[%s6160_s1 + $0xe0] sm:$0xf]  ;;  %v4232_v39 = vld [vmem:[%s6160_s1 + $0xec] sm:$0xf0]  ;;  %v4230_v40 = vld [vmem:[%s6160_s1 + $0xe4] sm:$0xf]  ;;  %v3232_v41 = vor.u32 %v4231_v31, %v3229_v32 }
  0x19   :  { %385 = vmatpush.bf16.msra.mxu1 %v3000_v5  ;;  %434 = vmatpush.bf16.msra.mxu2 %v3004_v6  ;;  %v3221_v42 = vld [vmem:[%s6160_s1 + $0xf0] sm:$0xf0]  ;;  %v3211_v43 = vld [vmem:[%s6160_s1 + $0xc8] sm:$0xf]  ;;  %v4229_v44 = vld [vmem:[%s6160_s1 + $0xd4] sm:$0xf0]  ;;  %v3220_v47 = vor.u32 %v4232_v39, %v3219_v38 }
  0x1a   :  { %483 = vmatpush.bf16.msra.mxu3 %v3008_v10  ;;  %v4227_v45 = vld [vmem:[%s6160_s1 + $0xcc] sm:$0xf]  ;;  %v3213_v46 = vld [vmem:[%s6160_s1 + $0xd8] sm:$0xf0]  ;;  %v3224_v48 = vor.u32 %v4230_v40, %v3221_v42  ;;  %v3212_v49 = vor.u32 %v4229_v44, %v3211_v43  ;;  %v3203_v50 = vld [vmem:[%s6160_s1 + $0xc0] sm:$0xf] }
  0x1b   :  { %v4228_v51 = vld [vmem:[%s6160_s1 + $0xcc] sm:$0xf0]  ;;  %v3216_v52 = vor.u32 %v4227_v45, %v3213_v46  ;;  %v4226_v53 = vld [vmem:[%s6160_s1 + $0xc4] sm:$0xf]  ;;  %v3205_v54 = vld [vmem:[%s6160_s1 + $0xd0] sm:$0xf0] }
  0x1c   :  { %337 = vmatpush.bf16.msra.mxu0 %v2980_v16  ;;  %v3204_v55 = vor.u32 %v4228_v51, %v3203_v50  ;;  %v3195_v56 = vld [vmem:[%s6160_s1 + $0xa8] sm:$0xf]  ;;  %v4225_v57 = vld [vmem:[%s6160_s1 + $0xb4] sm:$0xf0]  ;;  %v4223_v58 = vld [vmem:[%s6160_s1 + $0xac] sm:$0xf]  ;;  %v3208_v59 = vor.u32 %v4226_v53, %v3205_v54 }
  0x1d   :  { %386 = vmatpush.bf16.msra.mxu1 %v2984_v18  ;;  %435 = vmatpush.bf16.msra.mxu2 %v2988_v19  ;;  %v3196_v60 = vor.u32 %v4225_v57, %v3195_v56  ;;  %v3197_v61 = vld [vmem:[%s6160_s1 + $0xb8] sm:$0xf0]  ;;  %v3187_v62 = vld [vmem:[%s6160_s1 + $0xa0] sm:$0xf]  ;;  %v4224_v63 = vld [vmem:[%s6160_s1 + $0xac] sm:$0xf0] }
  0x1e   :  { %484 = vmatpush.bf16.msra.mxu3 %v2992_v23  ;;  %v3200_v0 = vor.u32 %v4223_v58, %v3197_v61  ;;  %v4222_v1 = vld [vmem:[%s6160_s1 + $0xa4] sm:$0xf]  ;;  %v3189_v2 = vld [vmem:[%s6160_s1 + $0xb0] sm:$0xf0]  ;;  %v3188_v3 = vor.u32 %v4224_v63, %v3187_v62  ;;  %v4780_v5 = vld [vmem:[%s6161_s0 + $0x28] sm:$0xff] }
  0x1f   :  { %v3192_v4 = vor.u32 %v4222_v1, %v3189_v2  ;;  %v3179_v6 = vld [vmem:[%s6160_s1 + $0x88] sm:$0xf]  ;;  %v4221_v7 = vld [vmem:[%s6160_s1 + $0x94] sm:$0xf0]  ;;  %v4219_v8 = vld [vmem:[%s6160_s1 + $0x8c] sm:$0xf] }
  0x20   :  { %338 = vmatpush.bf16.msra.mxu0 %v2964_v30  ;;  %v3180_v9 = vor.u32 %v4221_v7, %v3179_v6  ;;  %v3181_v10 = vld [vmem:[%s6160_s1 + $0x98] sm:$0xf0]  ;;  %v3171_v11 = vld [vmem:[%s6160_s1 + $0x80] sm:$0xf]  ;;  %v4220_v12 = vld [vmem:[%s6160_s1 + $0x8c] sm:$0xf0] }
  0x21   :  { %387 = vmatpush.bf16.msra.mxu1 %v2968_v33  ;;  %436 = vmatpush.bf16.msra.mxu2 %v2972_v34  ;;  %v3184_v13 = vor.u32 %v4219_v8, %v3181_v10  ;;  %v3172_v14 = vor.u32 %v4220_v12, %v3171_v11  ;;  %v4218_v15 = vld [vmem:[%s6160_s1 + $0x84] sm:$0xf]  ;;  %v3173_v16 = vld [vmem:[%s6160_s1 + $0x90] sm:$0xf0]  ;;  %v3163_v19 = vld [vmem:[%s6160_s1 + $0x68] sm:$0xf] }
  0x22   :  { %485 = vmatpush.bf16.msra.mxu3 %v2976_v36  ;;  %v3176_v17 = vor.u32 %v4218_v15, %v3173_v16  ;;  %v4813_v18 = vld [vmem:[%s6161_s0 + $0x30] sm:$0xff]  ;;  %v4217_v20 = vld [vmem:[%s6160_s1 + $0x74] sm:$0xf0]  ;;  %v4215_v21 = vld [vmem:[%s6160_s1 + $0x6c] sm:$0xf] }
  0x23   :  { %339 = vmatmul.bf16.vlgmr.msra.gmra.mxu0 %v4711_v35  ;;  %v3164_v22 = vor.u32 %v4217_v20, %v3163_v19  ;;  %v3165_v23 = vld [vmem:[%s6160_s1 + $0x78] sm:$0xf0]  ;;  %v3155_v24 = vld [vmem:[%s6160_s1 + $0x60] sm:$0xf]  ;;  %v4216_v25 = vld [vmem:[%s6160_s1 + $0x6c] sm:$0xf0] }
  0x24   :  { %388 = vmatmul.bf16.vlgmr.msra.gmra.mxu1 %v4711_v35  ;;  %437 = vmatmul.bf16.vlgmr.msra.gmra.mxu2 %v4711_v35  ;;  %v3168_v26 = vor.u32 %v4215_v21, %v3165_v23  ;;  %v3156_v27 = vor.u32 %v4216_v25, %v3155_v24  ;;  %v4214_v28 = vld [vmem:[%s6160_s1 + $0x64] sm:$0xf]  ;;  %v3157_v29 = vld [vmem:[%s6160_s1 + $0x70] sm:$0xf0]  ;;  %v4846_v31 = vld [vmem:[%s6161_s0 + $0x38] sm:$0xff] }
  0x25   :  { %809 = vmatpush.bf16.msrb.mxu2 %v3228_v37  ;;  %486 = vmatmul.bf16.vlgmr.msra.gmra.mxu3 %v4711_v35  ;;  %v3160_v30 = vor.u32 %v4214_v28, %v3157_v29  ;;  %v3147_v32 = vld [vmem:[%s6160_s1 + $0x48] sm:$0xf]  ;;  %v4213_v33 = vld [vmem:[%s6160_s1 + $0x54] sm:$0xf0]  ;;  %v4211_v34 = vld [vmem:[%s6160_s1 + $0x4c] sm:$0xf] }
  0x26   :  { %858 = vmatpush.bf16.msrb.mxu3 %v3232_v41  ;;  %711 = vmatpush.bf16.msrb.mxu0 %v3220_v47  ;;  %v3148_v36 = vor.u32 %v4213_v33, %v3147_v32  ;;  %v3149_v37 = vld [vmem:[%s6160_s1 + $0x58] sm:$0xf0]  ;;  %v3139_v38 = vld [vmem:[%s6160_s1 + $0x40] sm:$0xf]  ;;  %v4212_v39 = vld [vmem:[%s6160_s1 + $0x4c] sm:$0xf0] }
  0x27   :  { %760 = vmatpush.bf16.msrb.mxu1 %v3224_v48  ;;  %v3152_v40 = vor.u32 %v4211_v34, %v3149_v37  ;;  %v3140_v41 = vor.u32 %v4212_v39, %v3139_v38  ;;  %v4210_v42 = vld [vmem:[%s6160_s1 + $0x44] sm:$0xf]  ;;  %v3141_v43 = vld [vmem:[%s6160_s1 + $0x50] sm:$0xf0]  ;;  %v3131_v46 = vld [vmem:[%s6160_s1 + $0x28] sm:$0xf] }
  0x28   :  { %v3144_v44 = vor.u32 %v4210_v42, %v3141_v43  ;;  %v4234_v45 = vld [vmem:[%s6161_s0 + $0x40] sm:$0xff]  ;;  %v4209_v47 = vld [vmem:[%s6160_s1 + $0x34] sm:$0xf0]  ;;  %v4207_v48 = vld [vmem:[%s6160_s1 + $0x2c] sm:$0xf] }
  0x29   :  { %810 = vmatpush.bf16.msrb.mxu2 %v3212_v49  ;;  %v3132_v49 = vor.u32 %v4209_v47, %v3131_v46  ;;  %v3133_v50 = vld [vmem:[%s6160_s1 + $0x38] sm:$0xf0]  ;;  %v3123_v51 = vld [vmem:[%s6160_s1 + $0x20] sm:$0xf]  ;;  %v3125_v56 = vld [vmem:[%s6160_s1 + $0x30] sm:$0xf0] }
  0x2a   :  { %859 = vmatpush.bf16.msrb.mxu3 %v3216_v52  ;;  %712 = vmatpush.bf16.msrb.mxu0 %v3204_v55  ;;  %v4208_v52 = vld [vmem:[%s6160_s1 + $0x2c] sm:$0xf0]  ;;  %v3136_v53 = vor.u32 %v4207_v48, %v3133_v50  ;;  %v4206_v55 = vld [vmem:[%s6160_s1 + $0x24] sm:$0xf]  ;;  %v4235_v58 = vld [vmem:[%s6161_s0 + $0x48] sm:$0xff] }
  0x2b   :  { %761 = vmatpush.bf16.msrb.mxu1 %v3208_v59  ;;  %v3124_v54 = vor.u32 %v4208_v52, %v3123_v51  ;;  %v3128_v57 = vor.u32 %v4206_v55, %v3125_v56  ;;  %v3115_v59 = vld [vmem:[%s6160_s1 + $0x8] sm:$0xf]  ;;  %v4203_v61 = vld [vmem:[%s6160_s1 + $0xc] sm:$0xf]  ;;  %v3117_v63 = vld [vmem:[%s6160_s1 + $0x18] sm:$0xf0] }
  0x2c   :  { %v4236_v1 = vld [vmem:[%s6161_s0 + $0x50] sm:$0xff]  ;;  %v3107_v2 = vld [vmem:[%s6160_s1] sm:$0xf]  ;;  %v4309_v10 = vld [vmem:[%s6160_s1 + $0x2f4] sm:$0xf0] }
  0x2d   :  { %811 = vmatpush.bf16.msrb.mxu2 %v3196_v60  ;;  %v4205_v60 = vld [vmem:[%s6160_s1 + $0x14] sm:$0xf0]  ;;  %v3109_v7 = vld [vmem:[%s6160_s1 + $0x10] sm:$0xf0]  ;;  %v4307_v11 = vld [vmem:[%s6160_s1 + $0x2ec] sm:$0xf] }
  0x2e   :  { %860 = vmatpush.bf16.msrb.mxu3 %v3200_v0  ;;  %713 = vmatpush.bf16.msrb.mxu0 %v3188_v3  ;;  %v3116_v62 = vor.u32 %v4205_v60, %v3115_v59  ;;  %v3120_v0 = vor.u32 %v4203_v61, %v3117_v63  ;;  %v4204_v3 = vld [vmem:[%s6160_s1 + $0xc] sm:$0xf0]  ;;  %v4237_v15 = vld [vmem:[%s6161_s0 + $0x58] sm:$0xff]  ;;  %v3411_v16 = vld [vmem:[%s6160_s1 + $0x2e0] sm:$0xf] }
  0x2f   :  { %762 = vmatpush.bf16.msrb.mxu1 %v3192_v4  ;;  %v4202_v4 = vld [vmem:[%s6160_s1 + $0x4] sm:$0xf]  ;;  %v3108_v6 = vor.u32 %v4204_v3, %v3107_v2  ;;  %v3413_v21 = vld [vmem:[%s6160_s1 + $0x2f0] sm:$0xf0]  ;;  %v3403_v23 = vld [vmem:[%s6160_s1 + $0x2c8] sm:$0xf] }
  0x30   :  { %v3112_v8 = vor.u32 %v4202_v4, %v3109_v7  ;;  %v4306_v19 = vld [vmem:[%s6160_s1 + $0x2e4] sm:$0xf]  ;;  %v4305_v24 = vld [vmem:[%s6160_s1 + $0x2d4] sm:$0xf0]  ;;  %v4303_v25 = vld [vmem:[%s6160_s1 + $0x2cc] sm:$0xf] }
  0x31   :  { %812 = vmatpush.bf16.msrb.mxu2 %v3180_v9  ;;  %v3419_v9 = vld [vmem:[%s6160_s1 + $0x2e8] sm:$0xf]  ;;  %v4194_v29 = vld [vmem:[%s6161_s0] sm:$0xff]  ;;  %v4304_v34 = vld [vmem:[%s6160_s1 + $0x2cc] sm:$0xf0] }
  0x32   :  { %861 = vmatpush.bf16.msrb.mxu3 %v3184_v13  ;;  %714 = vmatpush.bf16.msrb.mxu0 %v3172_v14  ;;  %v3420_v12 = vor.u32 %v4309_v10, %v3419_v9  ;;  %v3421_v13 = vld [vmem:[%s6160_s1 + $0x2f8] sm:$0xf0]  ;;  %v3395_v33 = vld [vmem:[%s6160_s1 + $0x2c0] sm:$0xf]  ;;  %v3397_v38 = vld [vmem:[%s6160_s1 + $0x2d0] sm:$0xf0] }
  0x33   :  { %344 = vmatmul.bf16.gmra.mxu0 %v4780_v5  ;;  %763 = vmatpush.bf16.msrb.mxu1 %v3176_v17  ;;  %v3424_v14 = vor.u32 %v4307_v11, %v3421_v13  ;;  %v4308_v17 = vld [vmem:[%s6160_s1 + $0x2ec] sm:$0xf0]  ;;  %v3396_v37 = vor.u32 %v4304_v34, %v3395_v33  ;;  %v4299_v46 = vld [vmem:[%s6160_s1 + $0x2ac] sm:$0xf]  ;;  %v3389_v48 = vld [vmem:[%s6160_s1 + $0x2b8] sm:$0xf0] }
  0x34   :  { %393 = vmatmul.bf16.gmra.mxu1 %v4780_v5  ;;  %442 = vmatmul.bf16.gmra.mxu2 %v4780_v5  ;;  %v3412_v20 = vor.u32 %v4308_v17, %v3411_v16  ;;  %v4195_v51 = vld [vmem:[%s6161_s0 + $0x8] sm:$0xff]  ;;  %v3379_v55 = vld [vmem:[%s6160_s1 + $0x2a0] sm:$0xf]  ;;  %v4300_v56 = vld [vmem:[%s6160_s1 + $0x2ac] sm:$0xf0] }
  0x35   :  { %491 = vmatmul.bf16.gmra.mxu3 %v4780_v5  ;;  %813 = vmatpush.bf16.msrb.mxu2 %v3164_v22  ;;  %v3416_v22 = vor.u32 %v4306_v19, %v3413_v21  ;;  %v3381_v59 = vld [vmem:[%s6160_s1 + $0x2b0] sm:$0xf0]  ;;  %v4297_v2 = vld [vmem:[%s6160_s1 + $0x294] sm:$0xf0]  ;;  %v4295_v3 = vld [vmem:[%s6160_s1 + $0x28c] sm:$0xf] }
  0x36   :  { %862 = vmatpush.bf16.msrb.mxu3 %v3168_v26  ;;  %715 = vmatpush.bf16.msrb.mxu0 %v3156_v27  ;;  %v3404_v26 = vor.u32 %v4305_v24, %v3403_v23  ;;  %v3405_v27 = vld [vmem:[%s6160_s1 + $0x2d8] sm:$0xf0]  ;;  %v4196_v9 = vld [vmem:[%s6161_s0 + $0x10] sm:$0xff]  ;;  %v3363_v13 = vld [vmem:[%s6160_s1 + $0x280] sm:$0xf] }
  0x37   :  { %764 = vmatpush.bf16.msrb.mxu1 %v3160_v30  ;;  %v3408_v28 = vor.u32 %v4303_v25, %v3405_v27  ;;  %v3365_v17 = vld [vmem:[%s6160_s1 + $0x290] sm:$0xf0]  ;;  %v3355_v24 = vld [vmem:[%s6160_s1 + $0x268] sm:$0xf]  ;;  %v4293_v25 = vld [vmem:[%s6160_s1 + $0x274] sm:$0xf0] }
  0x38   :  { %v3356_v27 = vor.u32 %v4293_v25, %v3355_v24  ;;  %v4197_v34 = vld [vmem:[%s6161_s0 + $0x18] sm:$0xff] }
  0x39   :  { %814 = vmatpush.bf16.msrb.mxu2 %v3148_v36  ;;  %v4302_v36 = vld [vmem:[%s6160_s1 + $0x2c4] sm:$0xf] }
  0x3a   :  { %863 = vmatpush.bf16.msrb.mxu3 %v3152_v40  ;;  %716 = vmatpush.bf16.msrb.mxu0 %v3140_v41  ;;  %v3400_v39 = vor.u32 %v4302_v36, %v3397_v38 }
  0x3b   :  { %765 = vmatpush.bf16.msrb.mxu1 %v3144_v44  ;;  %v3387_v44 = vld [vmem:[%s6160_s1 + $0x2a8] sm:$0xf] }
  0x3d   :  { %815 = vmatpush.bf16.msrb.mxu2 %v3132_v49  ;;  %v3392_v49 = vor.u32 %v4299_v46, %v3389_v48 }
  0x3e   :  { %864 = vmatpush.bf16.msrb.mxu3 %v3136_v53  ;;  %717 = vmatpush.bf16.msrb.mxu0 %v3124_v54 }
  0x3f   :  { %766 = vmatpush.bf16.msrb.mxu1 %v3128_v57  ;;  %v4298_v57 = vld [vmem:[%s6160_s1 + $0x2a4] sm:$0xf] }
  0x40   :  { %v3384_v60 = vor.u32 %v4298_v57, %v3381_v59  ;;  %v3339_v57 = vld [vmem:[%s6160_s1 + $0x248] sm:$0xf]  ;;  %v4287_v59 = vld [vmem:[%s6160_s1 + $0x24c] sm:$0xf] }
  0x41   :  { %816 = vmatpush.bf16.msrb.mxu2 %v3116_v62 }
  0x42   :  { %865 = vmatpush.bf16.msrb.mxu3 %v3120_v0  ;;  %718 = vmatpush.bf16.msrb.mxu0 %v3108_v6  ;;  %v3373_v6 = vld [vmem:[%s6160_s1 + $0x298] sm:$0xf0] }
  0x43   :  { %349 = vmatmul.bf16.gmra.mxu0 %v4813_v18  ;;  %767 = vmatpush.bf16.msrb.mxu1 %v3112_v8  ;;  %v3376_v7 = vor.u32 %v4295_v3, %v3373_v6 }
  0x44   :  { %398 = vmatmul.bf16.gmra.mxu1 %v4813_v18  ;;  %447 = vmatmul.bf16.gmra.mxu2 %v4813_v18 }
  0x45   :  { %496 = vmatmul.bf16.gmra.mxu3 %v4813_v18  ;;  %1262 = vmatpush.bf16.msra.mxu2 %v3420_v12 }
  0x46   :  { %1311 = vmatpush.bf16.msra.mxu3 %v3424_v14  ;;  %1164 = vmatpush.bf16.msra.mxu0 %v3412_v20  ;;  %v4296_v14 = vld [vmem:[%s6160_s1 + $0x28c] sm:$0xf0] }
  0x47   :  { %1213 = vmatpush.bf16.msra.mxu1 %v3416_v22  ;;  %v3364_v16 = vor.u32 %v4296_v14, %v3363_v13  ;;  %v4288_v13 = vld [vmem:[%s6160_s1 + $0x24c] sm:$0xf0]  ;;  %v4286_v14 = vld [vmem:[%s6160_s1 + $0x244] sm:$0xf] }
  0x49   :  { %1263 = vmatpush.bf16.msra.mxu2 %v3404_v26  ;;  %v4291_v26 = vld [vmem:[%s6160_s1 + $0x26c] sm:$0xf] }
  0x4a   :  { %1312 = vmatpush.bf16.msra.mxu3 %v3408_v28  ;;  %1165 = vmatpush.bf16.msra.mxu0 %v3396_v37  ;;  %v3357_v28 = vld [vmem:[%s6160_s1 + $0x278] sm:$0xf0] }
  0x4b   :  { %1214 = vmatpush.bf16.msra.mxu1 %v3400_v39  ;;  %v3347_v39 = vld [vmem:[%s6160_s1 + $0x260] sm:$0xf] }
  0x4e   :  { %1313 = vmatpush.bf16.msra.mxu3 %v3392_v49 }
  0x4f   :  { %1215 = vmatpush.bf16.msra.mxu1 %v3384_v60 }
  0x52   :  { %1314 = vmatpush.bf16.msra.mxu3 %v3376_v7 }
  0x53   :  { %354 = vmatmul.bf16.gmra.mxu0 %v4846_v31 }
  0x54   :  { %403 = vmatmul.bf16.gmra.mxu1 %v4846_v31  ;;  %452 = vmatmul.bf16.gmra.mxu2 %v4846_v31 }
  0x55   :  { %501 = vmatmul.bf16.gmra.mxu3 %v4846_v31 }
  0x63   :  { %359 = vmatmul.bf16.gmra.mxu0 %v4234_v45 }
  0x64   :  { %408 = vmatmul.bf16.gmra.mxu1 %v4234_v45  ;;  %457 = vmatmul.bf16.gmra.mxu2 %v4234_v45 }
  0x65   :  { %506 = vmatmul.bf16.gmra.mxu3 %v4234_v45  ;;  %v4301_v45 = vld [vmem:[%s6160_s1 + $0x2b4] sm:$0xf0] }
  0x66   :  { %v3388_v47 = vor.u32 %v4301_v45, %v3387_v44  ;;  %v4292_v44 = vld [vmem:[%s6160_s1 + $0x26c] sm:$0xf0]  ;;  %v4290_v45 = vld [vmem:[%s6160_s1 + $0x264] sm:$0xf] }
  0x67   :  { %v3348_v46 = vor.u32 %v4292_v44, %v3347_v39 }
  0x68   :  { %1264 = vmatpush.bf16.msra.mxu2 %v3388_v47  ;;  %v3349_v47 = vld [vmem:[%s6160_s1 + $0x270] sm:$0xf0] }
  0x69   :  { %v3352_v48 = vor.u32 %v4290_v45, %v3349_v47 }
  0x73   :  { %364 = vmatmul.bf16.gmra.mxu0 %v4235_v58 }
  0x74   :  { %413 = vmatmul.bf16.gmra.mxu1 %v4235_v58  ;;  %462 = vmatmul.bf16.gmra.mxu2 %v4235_v58 }
  0x75   :  { %511 = vmatmul.bf16.gmra.mxu3 %v4235_v58  ;;  %v3380_v58 = vor.u32 %v4300_v56, %v3379_v55 }
  0x77   :  { %1166 = vmatpush.bf16.msra.mxu0 %v3380_v58  ;;  %v4289_v58 = vld [vmem:[%s6160_s1 + $0x254] sm:$0xf0] }
  0x78   :  { %v3340_v60 = vor.u32 %v4289_v58, %v3339_v57  ;;  %v4284_v57 = vld [vmem:[%s6160_s1 + $0x22c] sm:$0xf0]  ;;  %v4282_v58 = vld [vmem:[%s6160_s1 + $0x224] sm:$0xf] }
  0x7b   :  { %1167 = vmatpush.bf16.msra.mxu0 %v3364_v16  ;;  %v3333_v16 = vld [vmem:[%s6160_s1 + $0x250] sm:$0xf0] }
  0x7f   :  { %1168 = vmatpush.bf16.msra.mxu0 %v3348_v46 }
  0x83   :  { %369 = vmatmul.bf16.gmra.mxu0 %v4236_v1 }
  0x84   :  { %418 = vmatmul.bf16.gmra.mxu1 %v4236_v1  ;;  %467 = vmatmul.bf16.gmra.mxu2 %v4236_v1 }
  0x85   :  { %516 = vmatmul.bf16.gmra.mxu3 %v4236_v1  ;;  %v3371_v1 = vld [vmem:[%s6160_s1 + $0x288] sm:$0xf] }
  0x86   :  { %v3372_v4 = vor.u32 %v4297_v2, %v3371_v1  ;;  %v3341_v1 = vld [vmem:[%s6160_s1 + $0x258] sm:$0xf0] }
  0x87   :  { %v3344_v2 = vor.u32 %v4287_v59, %v3341_v1 }
  0x88   :  { %1265 = vmatpush.bf16.msra.mxu2 %v3372_v4 }
  0x8c   :  { %1266 = vmatpush.bf16.msra.mxu2 %v3356_v27  ;;  %v3323_v27 = vld [vmem:[%s6160_s1 + $0x228] sm:$0xf] }
  0x90   :  { %1267 = vmatpush.bf16.msra.mxu2 %v3340_v60  ;;  %v3317_v60 = vld [vmem:[%s6160_s1 + $0x230] sm:$0xf0] }
  0x91   :  { %v3320_v1 = vor.u32 %v4282_v58, %v3317_v60 }
  0x93   :  { %374 = vmatmul.bf16.gmra.mxu0 %v4237_v15 }
  0x94   :  { %423 = vmatmul.bf16.gmra.mxu1 %v4237_v15  ;;  %472 = vmatmul.bf16.gmra.mxu2 %v4237_v15 }
  0x95   :  { %521 = vmatmul.bf16.gmra.mxu3 %v4237_v15  ;;  %v4294_v15 = vld [vmem:[%s6160_s1 + $0x284] sm:$0xf] }
  0x96   :  { %v3368_v19 = vor.u32 %v4294_v15, %v3365_v17  ;;  %v3336_v17 = vor.u32 %v4286_v14, %v3333_v16  ;;  %v4281_v16 = vld [vmem:[%s6160_s1 + $0x214] sm:$0xf0] }
  0x98   :  { %1216 = vmatpush.bf16.msra.mxu1 %v3368_v19 }
  0x9c   :  { %1217 = vmatpush.bf16.msra.mxu1 %v3352_v48  ;;  %v3315_v48 = vld [vmem:[%s6160_s1 + $0x220] sm:$0xf] }
  0x9d   :  { %v3316_v59 = vor.u32 %v4284_v57, %v3315_v48 }
  0xa0   :  { %v4975_v30 = vpop.f32.mrf.mxu0  ;;  %1218 = vmatpush.bf16.msra.mxu1 %v3336_v17 }
  0xa1   :  { %v4977_v32 = vpop.f32.mrf.mxu1 }
  0xa3   :  { %719 = vmatmul.bf16.vlgmr.msrb.gmra.mxu0 %v4194_v29 }
  0xa4   :  { %768 = vmatmul.bf16.vlgmr.msrb.gmra.mxu1 %v4194_v29  ;;  %817 = vmatmul.bf16.vlgmr.msrb.gmra.mxu2 %v4194_v29 }
  0xa5   :  { %866 = vmatmul.bf16.vlgmr.msrb.gmra.mxu3 %v4194_v29  ;;  %v3360_v29 = vor.u32 %v4291_v26, %v3357_v28  ;;  %v4285_v28 = vld [vmem:[%s6160_s1 + $0x234] sm:$0xf0]  ;;  %1219 = vmatpush.bf16.msra.mxu1 %v3320_v1 }
  0xa7   :  { %v4991_v40 = vpop.f32.mrf.mxu2  ;;  %1315 = vmatpush.bf16.msra.mxu3 %v3360_v29  ;;  %v3324_v29 = vor.u32 %v4285_v28, %v3323_v27  ;;  %v3309_v27 = vld [vmem:[%s6160_s1 + $0x218] sm:$0xf0] }
  0xa8   :  { %v4993_v41 = vpop.f32.mrf.mxu3  ;;  %v4995_v42 = vpop.f32.mrf.mxu0 }
  0xa9   :  { %v4997_v43 = vpop.f32.mrf.mxu1  ;;  %1268 = vmatpush.bf16.msra.mxu2 %v3324_v29  ;;  %v3299_v29 = vld [vmem:[%s6160_s1 + $0x200] sm:$0xf] }
  0xab   :  { %1316 = vmatpush.bf16.msra.mxu3 %v3344_v2 }
  0xaf   :  { %v5011_v50 = vpop.f32.mrf.mxu2 }
  0xb0   :  { %v5016_v52 = vpop.f32.mrf.mxu3  ;;  %v5018_v53 = vpop.f32.mrf.mxu0 }
  0xb1   :  { %v5020_v54 = vpop.f32.mrf.mxu1 }
  0xb3   :  { %724 = vmatmul.bf16.gmra.mxu0 %v4195_v51 }
  0xb4   :  { %773 = vmatmul.bf16.gmra.mxu1 %v4195_v51  ;;  %822 = vmatmul.bf16.gmra.mxu2 %v4195_v51 }
  0xb5   :  { %871 = vmatmul.bf16.gmra.mxu3 %v4195_v51 }
  0xb7   :  { %v5034_v61 = vpop.f32.mrf.mxu2 }
  0xb8   :  { %v5036_v62 = vpop.f32.mrf.mxu3  ;;  %v5038_v63 = vpop.f32.mrf.mxu0 }
  0xb9   :  { %v5040_v0 = vpop.f32.mrf.mxu1 }
  0xbf   :  { %v5054_v8 = vpop.f32.mrf.mxu2 }
  0xc0   :  { %v5059_v10 = vpop.f32.mrf.mxu3  ;;  %v5061_v11 = vpop.f32.mrf.mxu0 }
  0xc1   :  { %v5063_v12 = vpop.f32.mrf.mxu1 }
  0xc3   :  { %729 = vmatmul.bf16.gmra.mxu0 %v4196_v9 }
  0xc4   :  { %778 = vmatmul.bf16.gmra.mxu1 %v4196_v9  ;;  %827 = vmatmul.bf16.gmra.mxu2 %v4196_v9 }
  0xc5   :  { %876 = vmatmul.bf16.gmra.mxu3 %v4196_v9  ;;  %v3331_v9 = vld [vmem:[%s6160_s1 + $0x240] sm:$0xf] }
  0xc6   :  { %v3332_v15 = vor.u32 %v4288_v13, %v3331_v9 }
  0xc7   :  { %v5077_v20 = vpop.f32.mrf.mxu2 }
  0xc8   :  { %v5079_v21 = vpop.f32.mrf.mxu3  ;;  %v5081_v22 = vpop.f32.mrf.mxu0  ;;  %1169 = vmatpush.bf16.msra.mxu0 %v3332_v15  ;;  %v3307_v15 = vld [vmem:[%s6160_s1 + $0x208] sm:$0xf] }
  0xc9   :  { %v5083_v23 = vpop.f32.mrf.mxu1  ;;  %v3308_v17 = vor.u32 %v4281_v16, %v3307_v15 }
  0xcb   :  { %1269 = vmatpush.bf16.msra.mxu2 %v3308_v17 }
  0xcc   :  { %1170 = vmatpush.bf16.msra.mxu0 %v3316_v59  ;;  %v3301_v59 = vld [vmem:[%s6160_s1 + $0x210] sm:$0xf0] }
  0xcf   :  { %v5097_v33 = vpop.f32.mrf.mxu2 }
  0xd0   :  { %v5102_v36 = vpop.f32.mrf.mxu3  ;;  %v5104_v37 = vpop.f32.mrf.mxu0 }
  0xd1   :  { %v5106_v38 = vpop.f32.mrf.mxu1 }
  0xd3   :  { %734 = vmatmul.bf16.gmra.mxu0 %v4197_v34 }
  0xd4   :  { %783 = vmatmul.bf16.gmra.mxu1 %v4197_v34  ;;  %832 = vmatmul.bf16.gmra.mxu2 %v4197_v34 }
  0xd5   :  { %881 = vmatmul.bf16.gmra.mxu3 %v4197_v34  ;;  %v3325_v34 = vld [vmem:[%s6160_s1 + $0x238] sm:$0xf0] }
  0xd7   :  { %v5120_v49 = vpop.f32.mrf.mxu2 }
  0xd8   :  { %v5122_v51 = vpop.f32.mrf.mxu3  ;;  %v5124_v55 = vpop.f32.mrf.mxu0 }
  0xd9   :  { %6170 = vst [vmem:[#allocation3_spill] sm:$0xff] %v5122_v51  ;;  %v5126_v56 = vpop.f32.mrf.mxu1 }
  0xda   :  { %6171 = vst [vmem:[#allocation4_spill] sm:$0xff] %v5124_v55 }
  0xdb   :  { %6172 = vst [vmem:[#allocation5_spill] sm:$0xff] %v5126_v56 }
  0xdf   :  { %v5140_v3 = vpop.f32.mrf.mxu2 }
  0xe0   :  { %6173 = vst [vmem:[#allocation6_spill] sm:$0xff] %v5140_v3  ;;  %v5142_v4 = vpop.f32.mrf.mxu3  ;;  %v5144_v6 = vpop.f32.mrf.mxu0 }
  0xe1   :  { %6174 = vst [vmem:[#allocation7_spill] sm:$0xff] %v5142_v4  ;;  %v5146_v7 = vpop.f32.mrf.mxu1  ;;  %v4274_v4 = vld [vmem:[%s6161_s0 + $0x60] sm:$0xff] }
  0xe2   :  { %6175 = vst [vmem:[#allocation8_spill] sm:$0xff] %v5144_v6 }
  0xe3   :  { %6176 = vst [vmem:[#allocation9_spill] sm:$0xff] %v5146_v7  ;;  %739 = vmatmul.bf16.gmra.mxu0 %v4711_v35 }
  0xe4   :  { %788 = vmatmul.bf16.gmra.mxu1 %v4711_v35  ;;  %837 = vmatmul.bf16.gmra.mxu2 %v4711_v35 }
  0xe5   :  { %886 = vmatmul.bf16.gmra.mxu3 %v4711_v35  ;;  %v4283_v35 = vld [vmem:[%s6160_s1 + $0x22c] sm:$0xf] }
  0xe6   :  { %v3328_v39 = vor.u32 %v4283_v35, %v3325_v34  ;;  %v4280_v34 = vld [vmem:[%s6160_s1 + $0x20c] sm:$0xf0] }
  0xe7   :  { %v5164_v19 = vpop.f32.mrf.mxu2  ;;  %v3300_v58 = vor.u32 %v4280_v34, %v3299_v29 }
  0xe8   :  { %6177 = vst [vmem:[#allocation10_spill] sm:$0xff] %v5164_v19  ;;  %v5166_v24 = vpop.f32.mrf.mxu3  ;;  %v5168_v25 = vpop.f32.mrf.mxu0  ;;  %1317 = vmatpush.bf16.msra.mxu3 %v3328_v39  ;;  %v4278_v39 = vld [vmem:[%s6160_s1 + $0x204] sm:$0xf] }
  0xe9   :  { %6178 = vst [vmem:[#allocation11_spill] sm:$0xff] %v5166_v24  ;;  %v5170_v26 = vpop.f32.mrf.mxu1  ;;  %v3304_v1 = vor.u32 %v4278_v39, %v3301_v59  ;;  %1171 = vmatpush.bf16.msra.mxu0 %v3300_v58 }
  0xea   :  { %6179 = vst [vmem:[#allocation12_spill] sm:$0xff] %v5168_v25 }
  0xeb   :  { %6180 = vst [vmem:[#allocation13_spill] sm:$0xff] %v5170_v26  ;;  %1220 = vmatpush.bf16.msra.mxu1 %v3304_v1 }
  0xef   :  { %v5184_v44 = vpop.f32.mrf.mxu2 }
  0xf0   :  { %6181 = vst [vmem:[#allocation14_spill] sm:$0xff] %v5184_v44  ;;  %v5186_v45 = vpop.f32.mrf.mxu3  ;;  %v5188_v46 = vpop.f32.mrf.mxu0 }
  0xf1   :  { %6182 = vst [vmem:[#allocation15_spill] sm:$0xff] %v5186_v45  ;;  %v5190_v47 = vpop.f32.mrf.mxu1  ;;  %v4273_v45 = vld [vmem:[%s6161_s0 + $0x58] sm:$0xff] }
  0xf2   :  { %6183 = vst [vmem:[#allocation16_spill] sm:$0xff] %v5188_v46 }
  0xf3   :  { %6184 = vst [vmem:[#allocation17_spill] sm:$0xff] %v5190_v47  ;;  %744 = vmatmul.bf16.gmra.mxu0 %v4780_v5 }
  0xf4   :  { %793 = vmatmul.bf16.gmra.mxu1 %v4780_v5  ;;  %842 = vmatmul.bf16.gmra.mxu2 %v4780_v5 }
  0xf5   :  { %891 = vmatmul.bf16.gmra.mxu3 %v4780_v5  ;;  %v4279_v5 = vld [vmem:[%s6160_s1 + $0x20c] sm:$0xf] }
  0xf6   :  { %v3312_v28 = vor.u32 %v4279_v5, %v3309_v27 }
  0xf7   :  { %v5208_v2 = vpop.f32.mrf.mxu2 }
  0xf8   :  { %6185 = vst [vmem:[#allocation18_spill] sm:$0xff] %v5208_v2  ;;  %v5210_v9 = vpop.f32.mrf.mxu3  ;;  %v5212_v13 = vpop.f32.mrf.mxu0  ;;  %1318 = vmatpush.bf16.msra.mxu3 %v3312_v28 }
  0xf9   :  { %6186 = vst [vmem:[#allocation19_spill] sm:$0xff] %v5210_v9  ;;  %v5214_v14 = vpop.f32.mrf.mxu1 }
  0xfa   :  { %6187 = vst [vmem:[#allocation20_spill] sm:$0xff] %v5212_v13 }
  0xfb   :  { %6188 = vst [vmem:[#allocation21_spill] sm:$0xff] %v5214_v14 }
  0xff   :  { %v5228_v35 = vpop.f32.mrf.mxu2 }
 0x100   :  { %6189 = vst [vmem:[#allocation22_spill] sm:$0xff] %v5228_v35  ;;  %v5239_v48 = vpop.f32.mrf.mxu3  ;;  %v5241_v57 = vpop.f32.mrf.mxu0 }
 0x101   :  { %6190 = vst [vmem:[#allocation23_spill] sm:$0xff] %v5239_v48  ;;  %v5246_v60 = vpop.f32.mrf.mxu1  ;;  %v4272_v48 = vld [vmem:[%s6161_s0 + $0x50] sm:$0xff] }
 0x102   :  { %6191 = vst [vmem:[#allocation24_spill] sm:$0xff] %v5241_v57 }
 0x103   :  { %6192 = vst [vmem:[#allocation25_spill] sm:$0xff] %v5246_v60  ;;  %749 = vmatmul.bf16.gmra.mxu0 %v4813_v18 }
 0x104   :  { %798 = vmatmul.bf16.gmra.mxu1 %v4813_v18  ;;  %847 = vmatmul.bf16.gmra.mxu2 %v4813_v18 }
 0x105   :  { %896 = vmatmul.bf16.gmra.mxu3 %v4813_v18 }
 0x107   :  { %v5252_v15 = vpop.f32.mrf.mxu2 }
 0x108   :  { %6193 = vst [vmem:[#allocation26_spill] sm:$0xff] %v5252_v15  ;;  %v5254_v16 = vpop.f32.mrf.mxu3  ;;  %v5256_v5 = vpop.f32.mrf.mxu0 }
 0x109   :  { %6194 = vst [vmem:[#allocation27_spill] sm:$0xff] %v5254_v16  ;;  %v5258_v17 = vpop.f32.mrf.mxu1 }
 0x10a   :  { %6195 = vst [vmem:[#allocation28_spill] sm:$0xff] %v5256_v5 }
 0x10b   :  { %6196 = vst [vmem:[#allocation29_spill] sm:$0xff] %v5258_v17 }
 0x10f   :  { %v5260_v27 = vpop.f32.mrf.mxu2 }
 0x110   :  { %6197 = vst [vmem:[#allocation30_spill] sm:$0xff] %v5260_v27  ;;  %v5262_v28 = vpop.f32.mrf.mxu3  ;;  %v5264_v29 = vpop.f32.mrf.mxu0 }
 0x111   :  { %6198 = vst [vmem:[#allocation31_spill] sm:$0xff] %v5262_v28  ;;  %v5266_v34 = vpop.f32.mrf.mxu1 }
 0x112   :  { %6199 = vst [vmem:[#allocation32_spill] sm:$0xff] %v5264_v29 }
 0x113   :  { %6200 = vst [vmem:[#allocation33_spill] sm:$0xff] %v5266_v34  ;;  %754 = vmatmul.bf16.gmra.mxu0 %v4846_v31  ;;  %v4270_v34 = vld [vmem:[%s6161_s0 + $0x40] sm:$0xff] }
 0x114   :  { %803 = vmatmul.bf16.gmra.mxu1 %v4846_v31  ;;  %852 = vmatmul.bf16.gmra.mxu2 %v4846_v31 }
 0x115   :  { %901 = vmatmul.bf16.gmra.mxu3 %v4846_v31 }
 0x117   :  { %v5272_v18 = vpop.f32.mrf.mxu2 }
 0x118   :  { %6201 = vst [vmem:[#allocation34_spill] sm:$0xff] %v5272_v18  ;;  %v5274_v39 = vpop.f32.mrf.mxu3  ;;  %v5276_v58 = vpop.f32.mrf.mxu0 }
 0x119   :  { %6202 = vst [vmem:[#allocation35_spill] sm:$0xff] %v5274_v39  ;;  %v5278_v59 = vpop.f32.mrf.mxu1 }
 0x11a   :  { %6203 = vst [vmem:[#allocation36_spill] sm:$0xff] %v5276_v58 }
 0x11b   :  { %6204 = vst [vmem:[#allocation37_spill] sm:$0xff] %v5278_v59 }
 0x11f   :  { %v5280_v1 = vpop.f32.mrf.mxu2 }
 0x120   :  { %6205 = vst [vmem:[#allocation38_spill] sm:$0xff] %v5280_v1  ;;  %v5285_v29 = vpop.f32.mrf.mxu3  ;;  %v5287_v28 = vpop.f32.mrf.mxu0 }
 0x121   :  { %6206 = vst [vmem:[#allocation39_spill] sm:$0xff] %v5285_v29  ;;  %v5289_v17 = vpop.f32.mrf.mxu1  ;;  %v4271_v29 = vld [vmem:[%s6161_s0 + $0x48] sm:$0xff] }
 0x123   :  { %1172 = vmatmul.bf16.vlgmr.msra.gmra.mxu0 %v4270_v34 }
 0x124   :  { %1221 = vmatmul.bf16.vlgmr.msra.gmra.mxu1 %v4270_v34  ;;  %1270 = vmatmul.bf16.vlgmr.msra.gmra.mxu2 %v4270_v34 }
 0x125   :  { %1319 = vmatmul.bf16.vlgmr.msra.gmra.mxu3 %v4270_v34 }
 0x127   :  { %v5291_v31 = vpop.f32.mrf.mxu2 }
 0x128   :  { %v5293_v58 = vpop.f32.mrf.mxu3  ;;  %v5295_v59 = vpop.f32.mrf.mxu0 }
 0x129   :  { %v5297_v1 = vpop.f32.mrf.mxu1 }
 0x12f   :  { %v5299_v39 = vpop.f32.mrf.mxu2 }
 0x130   :  { %v5304_v18 = vpop.f32.mrf.mxu3  ;;  %v5306_v27 = vpop.f32.mrf.mxu0 }
 0x131   :  { %v5308_v5 = vpop.f32.mrf.mxu1 }
 0x133   :  { %1177 = vmatmul.bf16.gmra.mxu0 %v4271_v29 }
 0x134   :  { %1226 = vmatmul.bf16.gmra.mxu1 %v4271_v29  ;;  %1275 = vmatmul.bf16.gmra.mxu2 %v4271_v29 }
 0x135   :  { %1324 = vmatmul.bf16.gmra.mxu3 %v4271_v29 }
 0x137   :  { %v5310_v34 = vpop.f32.mrf.mxu2 }
 0x138   :  { %v5312_v16 = vpop.f32.mrf.mxu3  ;;  %v5314_v60 = vpop.f32.mrf.mxu0 }
 0x139   :  { %v5316_v15 = vpop.f32.mrf.mxu1 }
 0x13f   :  { %v5318_v57 = vpop.f32.mrf.mxu2 }
 0x140   :  { %v5323_v14 = vpop.f32.mrf.mxu3  ;;  %v5325_v35 = vpop.f32.mrf.mxu0 }
 0x141   :  { %v5327_v13 = vpop.f32.mrf.mxu1 }
 0x143   :  { %1182 = vmatmul.bf16.gmra.mxu0 %v4272_v48 }
 0x144   :  { %1231 = vmatmul.bf16.gmra.mxu1 %v4272_v48  ;;  %1280 = vmatmul.bf16.gmra.mxu2 %v4272_v48 }
 0x145   :  { %1329 = vmatmul.bf16.gmra.mxu3 %v4272_v48 }
 0x147   :  { %v5329_v29 = vpop.f32.mrf.mxu2 }
 0x148   :  { %v5331_v9 = vpop.f32.mrf.mxu3  ;;  %v5333_v47 = vpop.f32.mrf.mxu0 }
 0x149   :  { %v5335_v2 = vpop.f32.mrf.mxu1 }
 0x14f   :  { %v5337_v46 = vpop.f32.mrf.mxu2 }
 0x150   :  { %v5342_v26 = vpop.f32.mrf.mxu3  ;;  %v5344_v44 = vpop.f32.mrf.mxu0 }
 0x151   :  { %v5346_v25 = vpop.f32.mrf.mxu1 }
 0x153   :  { %1187 = vmatmul.bf16.gmra.mxu0 %v4273_v45 }
 0x154   :  { %1236 = vmatmul.bf16.gmra.mxu1 %v4273_v45  ;;  %1285 = vmatmul.bf16.gmra.mxu2 %v4273_v45 }
 0x155   :  { %1334 = vmatmul.bf16.gmra.mxu3 %v4273_v45  ;;  %v4317_v45 = vld [vmem:[%s6162_s3 + $0x38] sm:$0xff] }
 0x156   :  { %1797 = vmatpush.bf16.msrb.mxu2 %v4317_v45 }
 0x157   :  { %v5348_v48 = vpop.f32.mrf.mxu2 }
 0x158   :  { %v5350_v24 = vpop.f32.mrf.mxu3  ;;  %v5352_v7 = vpop.f32.mrf.mxu0 }
 0x159   :  { %6207 = vst [vmem:[#allocation40_spill] sm:$0xff] %v5350_v24  ;;  %v5354_v19 = vpop.f32.mrf.mxu1 }
 0x15a   :  { %6208 = vst [vmem:[#allocation41_spill] sm:$0xff] %v5352_v7  ;;  %v4341_v7 = vld [vmem:[%s6162_s3 + $0xf8] sm:$0xff] }
 0x15b   :  { %6209 = vst [vmem:[#allocation42_spill] sm:$0xff] %v5354_v19  ;;  %1688 = vmatpush.bf16.msrb.mxu1 %v4341_v7  ;;  %v4316_v7 = vld [vmem:[%s6162_s3 + $0x30] sm:$0xff] }
 0x15c   :  { %1798 = vmatpush.bf16.msrb.mxu2 %v4316_v7  ;;  %v4276_v7 = vld [vmem:[%s6161_s0 + $0x70] sm:$0xff] }
 0x15f   :  { %v5356_v6 = vpop.f32.mrf.mxu2 }
 0x160   :  { %6210 = vst [vmem:[#allocation43_spill] sm:$0xff] %v5356_v6  ;;  %v5361_v3 = vpop.f32.mrf.mxu3  ;;  %v5363_v56 = vpop.f32.mrf.mxu0  ;;  %v4325_v6 = vld [vmem:[%s6162_s3 + $0x78] sm:$0xff] }
 0x161   :  { %6211 = vst [vmem:[#allocation44_spill] sm:$0xff] %v5361_v3  ;;  %v5365_v55 = vpop.f32.mrf.mxu1  ;;  %1810 = vmatpush.bf16.msrb.mxu3 %v4325_v6  ;;  %v4275_v6 = vld [vmem:[%s6161_s0 + $0x68] sm:$0xff] }
 0x162   :  { %6212 = vst [vmem:[#allocation45_spill] sm:$0xff] %v5363_v56 }
 0x163   :  { %6213 = vst [vmem:[#allocation46_spill] sm:$0xff] %v5365_v55  ;;  %1192 = vmatmul.bf16.gmra.mxu0 %v4274_v4 }
 0x164   :  { %1241 = vmatmul.bf16.gmra.mxu1 %v4274_v4  ;;  %1290 = vmatmul.bf16.gmra.mxu2 %v4274_v4 }
 0x165   :  { %1339 = vmatmul.bf16.gmra.mxu3 %v4274_v4  ;;  %v4333_v4 = vld [vmem:[%s6162_s3 + $0xb8] sm:$0xff] }
 0x166   :  { %1675 = vmatpush.bf16.msrb.mxu0 %v4333_v4  ;;  %v4324_v4 = vld [vmem:[%s6162_s3 + $0x70] sm:$0xff] }
 0x167   :  { %v5373_v19 = vpop.f32.mrf.mxu2  ;;  %1811 = vmatpush.bf16.msrb.mxu3 %v4324_v4 }
 0x168   :  { %6214 = vst [vmem:[#allocation47_spill] sm:$0xff] %v5373_v19  ;;  %v5375_v3 = vpop.f32.mrf.mxu3  ;;  %v5377_v56 = vpop.f32.mrf.mxu0 }
 0x169   :  { %6215 = vst [vmem:[#allocation48_spill] sm:$0xff] %v5375_v3  ;;  %v5379_v55 = vpop.f32.mrf.mxu1  ;;  %v4340_v3 = vld [vmem:[%s6162_s3 + $0xf0] sm:$0xff] }
 0x16a   :  { %6216 = vst [vmem:[#allocation49_spill] sm:$0xff] %v5377_v56  ;;  %1689 = vmatpush.bf16.msrb.mxu1 %v4340_v3  ;;  %v4323_v3 = vld [vmem:[%s6162_s3 + $0x68] sm:$0xff] }
 0x16b   :  { %6217 = vst [vmem:[#allocation50_spill] sm:$0xff] %v5379_v55  ;;  %1812 = vmatpush.bf16.msrb.mxu3 %v4323_v3 }
 0x16f   :  { %v5387_v24 = vpop.f32.mrf.mxu2 }
 0x170   :  { %6218 = vst [vmem:[#allocation51_spill] sm:$0xff] %v5387_v24  ;;  %v5392_v45 = vpop.f32.mrf.mxu3  ;;  %v5394_v56 = vpop.f32.mrf.mxu0 }
 0x171   :  { %6219 = vst [vmem:[#allocation52_spill] sm:$0xff] %v5392_v45  ;;  %v5396_v55 = vpop.f32.mrf.mxu1 }
 0x172   :  { %6220 = vst [vmem:[#allocation53_spill] sm:$0xff] %v5394_v56 }
 0x173   :  { %6221 = vst [vmem:[#allocation54_spill] sm:$0xff] %v5396_v55  ;;  %1197 = vmatmul.bf16.gmra.mxu0 %v4275_v6 }
 0x174   :  { %1246 = vmatmul.bf16.gmra.mxu1 %v4275_v6  ;;  %1295 = vmatmul.bf16.gmra.mxu2 %v4275_v6 }
 0x175   :  { %1344 = vmatmul.bf16.gmra.mxu3 %v4275_v6  ;;  %v4332_v6 = vld [vmem:[%s6162_s3 + $0xb0] sm:$0xff] }
 0x176   :  { %1676 = vmatpush.bf16.msrb.mxu0 %v4332_v6 }
 0x177   :  { %v5404_v24 = vpop.f32.mrf.mxu2 }
 0x178   :  { %6222 = vst [vmem:[#allocation55_spill] sm:$0xff] %v5404_v24  ;;  %v5406_v45 = vpop.f32.mrf.mxu3  ;;  %v5408_v56 = vpop.f32.mrf.mxu0  ;;  %v4339_v24 = vld [vmem:[%s6162_s3 + $0xe8] sm:$0xff] }
 0x179   :  { %6223 = vst [vmem:[#allocation56_spill] sm:$0xff] %v5406_v45  ;;  %v5410_v55 = vpop.f32.mrf.mxu1  ;;  %v4315_v45 = vld [vmem:[%s6162_s3 + $0x28] sm:$0xff]  ;;  %1690 = vmatpush.bf16.msrb.mxu1 %v4339_v24 }
 0x17a   :  { %6224 = vst [vmem:[#allocation57_spill] sm:$0xff] %v5408_v56  ;;  %1799 = vmatpush.bf16.msrb.mxu2 %v4315_v45 }
 0x17b   :  { %6225 = vst [vmem:[#allocation58_spill] sm:$0xff] %v5410_v55 }
 0x17f   :  { %v5418_v19 = vpop.f32.mrf.mxu2 }
 0x180   :  { %6226 = vst [vmem:[#allocation59_spill] sm:$0xff] %v5418_v19  ;;  %v5423_v4 = vpop.f32.mrf.mxu3  ;;  %v5425_v56 = vpop.f32.mrf.mxu0  ;;  %v4331_v19 = vld [vmem:[%s6162_s3 + $0xa8] sm:$0xff] }
 0x181   :  { %6227 = vst [vmem:[#allocation60_spill] sm:$0xff] %v5423_v4  ;;  %v5427_v55 = vpop.f32.mrf.mxu1  ;;  %1677 = vmatpush.bf16.msrb.mxu0 %v4331_v19  ;;  %v4322_v19 = vld [vmem:[%s6162_s3 + $0x60] sm:$0xff] }
 0x182   :  { %6228 = vst [vmem:[#allocation61_spill] sm:$0xff] %v5425_v56  ;;  %1813 = vmatpush.bf16.msrb.mxu3 %v4322_v19  ;;  %v770_v19 = vadd.f32 %v5289_v17, %v4977_v32  ;;  %v819_v32 = vadd.f32 %v5291_v31, %v4991_v40  ;;  %v821_v31 = vadd.f32 %v5299_v39, %v5011_v50 }
 0x183   :  { %6229 = vst [vmem:[#allocation62_spill] sm:$0xff] %v5427_v55  ;;  %1202 = vmatmul.bf16.gmra.mxu0 %v4276_v7 }
 0x184   :  { %1251 = vmatmul.bf16.gmra.mxu1 %v4276_v7  ;;  %1300 = vmatmul.bf16.gmra.mxu2 %v4276_v7 }
 0x185   :  { %1349 = vmatmul.bf16.gmra.mxu3 %v4276_v7  ;;  %v4277_v7 = vld [vmem:[%s6161_s0 + $0x78] sm:$0xff] }
 0x187   :  { %v5435_v6 = vpop.f32.mrf.mxu2 }
 0x188   :  { %6230 = vst [vmem:[#allocation63_spill] sm:$0xff] %v5435_v6  ;;  %v5437_v4 = vpop.f32.mrf.mxu3  ;;  %v5439_v56 = vpop.f32.mrf.mxu0  ;;  %v4338_v6 = vld [vmem:[%s6162_s3 + $0xe0] sm:$0xff] }
 0x189   :  { %6231 = vst [vmem:[#allocation64_spill] sm:$0xff] %v5437_v4  ;;  %v5441_v55 = vpop.f32.mrf.mxu1  ;;  %v4314_v4 = vld [vmem:[%s6162_s3 + $0x20] sm:$0xff]  ;;  %1691 = vmatpush.bf16.msrb.mxu1 %v4338_v6  ;;  %v4313_v6 = vld [vmem:[%s6162_s3 + $0x18] sm:$0xff] }
 0x18a   :  { %6232 = vst [vmem:[#allocation65_spill] sm:$0xff] %v5439_v56  ;;  %1800 = vmatpush.bf16.msrb.mxu2 %v4314_v4  ;;  %v721_v4 = vadd.f32 %v5287_v28, %v4975_v30  ;;  %v4321_v30 = vld [vmem:[%s6162_s3 + $0x58] sm:$0xff]  ;;  %v772_v28 = vadd.f32 %v5297_v1, %v4997_v43  ;;  %v723_v1 = vadd.f32 %v5295_v59, %v4995_v42 }
 0x18b   :  { %6233 = vst [vmem:[#allocation66_spill] sm:$0xff] %v5441_v55  ;;  %1814 = vmatpush.bf16.msrb.mxu3 %v4321_v30  ;;  %v4337_v43 = vld [vmem:[%s6162_s3 + $0xd8] sm:$0xff] }
 0x18d   :  { %1692 = vmatpush.bf16.msrb.mxu1 %v4337_v43 }
 0x18e   :  { %1801 = vmatpush.bf16.msrb.mxu2 %v4313_v6 }
 0x18f   :  { %v5449_v45 = vpop.f32.mrf.mxu2 }
 0x190   :  { %6234 = vst [vmem:[#allocation67_spill] sm:$0xff] %v5449_v45  ;;  %v5454_v3 = vpop.f32.mrf.mxu3  ;;  %v5456_v56 = vpop.f32.mrf.mxu0  ;;  %v4330_v45 = vld [vmem:[%s6162_s3 + $0xa0] sm:$0xff] }
 0x191   :  { %6235 = vst [vmem:[#allocation68_spill] sm:$0xff] %v5454_v3  ;;  %v5458_v55 = vpop.f32.mrf.mxu1  ;;  %1678 = vmatpush.bf16.msrb.mxu0 %v4330_v45 }
 0x192   :  { %6236 = vst [vmem:[#allocation69_spill] sm:$0xff] %v5456_v56 }
 0x193   :  { %6237 = vst [vmem:[#allocation70_spill] sm:$0xff] %v5458_v55  ;;  %1207 = vmatmul.bf16.gmra.mxu0 %v4277_v7 }
 0x194   :  { %1256 = vmatmul.bf16.gmra.mxu1 %v4277_v7  ;;  %1305 = vmatmul.bf16.gmra.mxu2 %v4277_v7 }
 0x195   :  { %1354 = vmatmul.bf16.gmra.mxu3 %v4277_v7 }
 0x197   :  { %v5466_v24 = vpop.f32.mrf.mxu2 }
 0x198   :  { %6238 = vst [vmem:[#allocation71_spill] sm:$0xff] %v5466_v24  ;;  %v5468_v3 = vpop.f32.mrf.mxu3  ;;  %v5470_v56 = vpop.f32.mrf.mxu0 }
 0x199   :  { %6239 = vst [vmem:[#allocation72_spill] sm:$0xff] %v5468_v3  ;;  %v5472_v55 = vpop.f32.mrf.mxu1 }
 0x19a   :  { %6240 = vst [vmem:[#allocation73_spill] sm:$0xff] %v5470_v56 }
 0x19b   :  { %6241 = vst [vmem:[#allocation74_spill] sm:$0xff] %v5472_v55 }
 0x19f   :  { %v5482_v7 = vpop.f32.mrf.mxu2 }
 0x1a0   :  { %v5486_v56 = vpop.f32.mrf.mxu3  ;;  %v1173_v55 = vpop.f32.mrf.mxu0 }
 0x1a1   :  { %6242 = vst [vmem:[#allocation75_spill] sm:$0xff] %v5486_v56  ;;  %v5488_v3 = vadd.f32 %v1173_v55, %v721_v4  ;;  %v1222_v24 = vpop.f32.mrf.mxu1  ;;  %v868_v55 = vadd.f32 %v5293_v58, %v4993_v41  ;;  %v4329_v41 = vld [vmem:[%s6162_s3 + $0x98] sm:$0xff]  ;;  %v4312_v58 = vld [vmem:[%s6162_s3 + $0x10] sm:$0xff] }
 0x1a2   :  { %v5490_v51 = vadd.f32 %v1222_v24, %v770_v19  ;;  %1679 = vmatpush.bf16.msrb.mxu0 %v4329_v41  ;;  %1802 = vmatpush.bf16.msrb.mxu2 %v4312_v58  ;;  %v4310_v58 = vld [vmem:[%s6162_s3] sm:$0xff] }
 0x1a7   :  { %v1271_v17 = vpop.f32.mrf.mxu2 }
 0x1a8   :  { %v5504_v45 = vadd.f32 %v1271_v17, %v819_v32  ;;  %v1320_v24 = vpop.f32.mrf.mxu3  ;;  %v1175_v4 = vpop.f32.mrf.mxu0  ;;  %v870_v32 = vadd.f32 %v5304_v18, %v5016_v52  ;;  %v4311_v52 = vld [vmem:[%s6162_s3 + $0x8] sm:$0xff]  ;;  %v4328_v18 = vld [vmem:[%s6162_s3 + $0x90] sm:$0xff] }
 0x1a9   :  { %v5506_v19 = vadd.f32 %v1320_v24, %v868_v55  ;;  %v1224_v56 = vpop.f32.mrf.mxu1  ;;  %v726_v55 = vadd.f32 %v5306_v27, %v5018_v53  ;;  %v5536_v24 = vadd.f32 %v1175_v4, %v723_v1  ;;  %v4319_v53 = vld [vmem:[%s6162_s3 + $0x48] sm:$0xff]  ;;  %1803 = vmatpush.bf16.msrb.mxu2 %v4311_v52  ;;  %v4336_v4 = vld [vmem:[%s6162_s3 + $0xd0] sm:$0xff]  ;;  %1680 = vmatpush.bf16.msrb.mxu0 %v4328_v18 }
 0x1aa   :  { %v1424_v6 = vmax.f32 %v5488_v3, %v5504_v45  ;;  %v5510_v30 = vadd.f32 %v1224_v56, %v772_v28  ;;  %v4320_v56 = vld [vmem:[%s6162_s3 + $0x50] sm:$0xff]  ;;  %v775_v28 = vadd.f32 %v5308_v5, %v5020_v54  ;;  %1693 = vmatpush.bf16.msrb.mxu1 %v4336_v4  ;;  %v824_v1 = vadd.f32 %v5310_v34, %v5034_v61  ;;  %v4326_v4 = vld [vmem:[%s6162_s3 + $0x80] sm:$0xff] }
 0x1ab   :  { %v1425_v40 = vmax.f32 %v5490_v51, %v5506_v19  ;;  %1815 = vmatpush.bf16.msrb.mxu3 %v4320_v56  ;;  %v4318_v56 = vld [vmem:[%s6162_s3 + $0x40] sm:$0xff]  ;;  %v777_v61 = vadd.f32 %v5316_v15, %v5040_v0 }
 0x1ad   :  { %1804 = vmatpush.bf16.msrb.mxu2 %v4310_v58  ;;  %v4334_v58 = vld [vmem:[%s6162_s3 + $0xc0] sm:$0xff] }
 0x1af   :  { %v1273_v17 = vpop.f32.mrf.mxu2  ;;  %1816 = vmatpush.bf16.msrb.mxu3 %v4319_v53  ;;  %v4372_v53 = vld [vmem:[%s6162_s3 + $0x1f0] sm:$0xff] }
 0x1b0   :  { %v5538_v41 = vadd.f32 %v1273_v17, %v821_v31  ;;  %v1322_v42 = vpop.f32.mrf.mxu3  ;;  %v1178_v59 = vpop.f32.mrf.mxu0  ;;  %v4365_v31 = vld [vmem:[%s6162_s3 + $0x1b8] sm:$0xff]  ;;  %v728_v17 = vadd.f32 %v5314_v60, %v5038_v63  ;;  %v4327_v63 = vld [vmem:[%s6162_s3 + $0x88] sm:$0xff] }
 0x1b1   :  { %v5540_v43 = vadd.f32 %v1322_v42, %v870_v32  ;;  %v5542_v50 = vadd.f32 %v1178_v59, %v726_v55  ;;  %v1227_v39 = vpop.f32.mrf.mxu1  ;;  %v4373_v32 = vld [vmem:[%s6162_s3 + $0x1f8] sm:$0xff]  ;;  %v873_v55 = vadd.f32 %v5312_v16, %v5036_v62  ;;  %2112 = vmatpush.bf16.msra.mxu2 %v4365_v31  ;;  %v4335_v60 = vld [vmem:[%s6162_s3 + $0xc8] sm:$0xff]  ;;  %v4364_v16 = vld [vmem:[%s6162_s3 + $0x1b0] sm:$0xff]  ;;  %1681 = vmatpush.bf16.msrb.mxu0 %v4327_v63 }
 0x1b2   :  { %v1426_v54 = vmax.f32 %v5536_v24, %v5538_v41  ;;  %v5552_v5 = vadd.f32 %v1227_v39, %v775_v28  ;;  %1694 = vmatpush.bf16.msrb.mxu1 %v4335_v60  ;;  %v4357_v31 = vld [vmem:[%s6162_s3 + $0x178] sm:$0xff]  ;;  %v4362_v63 = vld [vmem:[%s6162_s3 + $0x1a0] sm:$0xff] }
 0x1b3   :  { %v1427_v27 = vmax.f32 %v5510_v30, %v5540_v43  ;;  %1817 = vmatpush.bf16.msrb.mxu3 %v4318_v56  ;;  %v826_v56 = vadd.f32 %v5318_v57, %v5054_v8  ;;  %v4371_v8 = vld [vmem:[%s6162_s3 + $0x1e8] sm:$0xff]  ;;  %v780_v57 = vadd.f32 %v5327_v13, %v5063_v12  ;;  %v4348_v12 = vld [vmem:[%s6162_s3 + $0x130] sm:$0xff]  ;;  %v6274_v43 = vld [vmem:[#allocation54_spill] sm:$0xff] }
 0x1b4   :  { %v4356_v13 = vld [vmem:[%s6162_s3 + $0x170] sm:$0xff] }
 0x1b5   :  { %2113 = vmatpush.bf16.msra.mxu2 %v4364_v16  ;;  %1682 = vmatpush.bf16.msrb.mxu0 %v4326_v4  ;;  %v4370_v16 = vld [vmem:[%s6162_s3 + $0x1e0] sm:$0xff]  ;;  %v4347_v4 = vld [vmem:[%s6162_s3 + $0x128] sm:$0xff]  ;;  %v4404_v30 = vld [vmem:[%s6162_s3 + $0x2f0] sm:$0xff] }
 0x1b6   :  { %1695 = vmatpush.bf16.msrb.mxu1 %v4334_v58  ;;  %v4355_v58 = vld [vmem:[%s6162_s3 + $0x168] sm:$0xff]  ;;  %v6273_v41 = vld [vmem:[#allocation17_spill] sm:$0xff] }
 0x1b7   :  { %v1276_v28 = vpop.f32.mrf.mxu2  ;;  %2125 = vmatpush.bf16.msra.mxu3 %v4373_v32  ;;  %v4363_v32 = vld [vmem:[%s6162_s3 + $0x1a8] sm:$0xff] }
 0x1b8   :  { %v5582_v34 = vadd.f32 %v1276_v28, %v824_v1  ;;  %v1325_v42 = vpop.f32.mrf.mxu3  ;;  %v1180_v59 = vpop.f32.mrf.mxu0  ;;  %v4349_v1 = vld [vmem:[%s6162_s3 + $0x138] sm:$0xff] }
 0x1b9   :  { %v5584_v39 = vadd.f32 %v1325_v42, %v873_v55  ;;  %v5586_v52 = vadd.f32 %v1180_v59, %v728_v17  ;;  %v1229_v62 = vpop.f32.mrf.mxu1  ;;  %v875_v55 = vadd.f32 %v5323_v14, %v5059_v10  ;;  %v731_v17 = vadd.f32 %v5325_v35, %v5061_v11  ;;  %1954 = vmatpush.bf16.msra.mxu0 %v4349_v1 }
 0x1ba   :  { %v1428_v0 = vmax.f32 %v5542_v50, %v5582_v34  ;;  %v5596_v15 = vadd.f32 %v1229_v62, %v777_v61  ;;  %1967 = vmatpush.bf16.msra.mxu1 %v4357_v31  ;;  %2114 = vmatpush.bf16.msra.mxu2 %v4363_v32  ;;  %v878_v1 = vadd.f32 %v5331_v9, %v5079_v21  ;;  %v4388_v50 = vld [vmem:[%s6162_s3 + $0x270] sm:$0xff] }
 0x1bb   :  { %v1429_v18 = vmax.f32 %v5552_v5, %v5584_v39  ;;  %2126 = vmatpush.bf16.msra.mxu3 %v4372_v53  ;;  %v829_v53 = vadd.f32 %v5329_v29, %v5077_v20  ;;  %v733_v31 = vadd.f32 %v5333_v47, %v5081_v22  ;;  %v4369_v20 = vld [vmem:[%s6162_s3 + $0x1d8] sm:$0xff]  ;;  %v782_v29 = vadd.f32 %v5335_v2, %v5083_v23  ;;  %v4346_v23 = vld [vmem:[%s6162_s3 + $0x120] sm:$0xff] }
 0x1bc   :  { %v4354_v2 = vld [vmem:[%s6162_s3 + $0x160] sm:$0xff]  ;;  %v6281_v34 = vld [vmem:[#allocation21_spill] sm:$0xff] }
 0x1bd   :  { %1955 = vmatpush.bf16.msra.mxu0 %v4348_v12  ;;  %v4345_v12 = vld [vmem:[%s6162_s3 + $0x118] sm:$0xff]  ;;  %v4394_v5 = vld [vmem:[%s6162_s3 + $0x2a0] sm:$0xff] }
 0x1be   :  { %1968 = vmatpush.bf16.msra.mxu1 %v4356_v13  ;;  %2115 = vmatpush.bf16.msra.mxu2 %v4362_v63  ;;  %v4353_v13 = vld [vmem:[%s6162_s3 + $0x158] sm:$0xff]  ;;  %v4359_v63 = vld [vmem:[%s6162_s3 + $0x188] sm:$0xff] }
 0x1bf   :  { %v1278_v28 = vpop.f32.mrf.mxu2  ;;  %2127 = vmatpush.bf16.msra.mxu3 %v4371_v8  ;;  %v6282_v39 = vld [vmem:[#allocation58_spill] sm:$0xff] }
 0x1c0   :  { %v5632_v61 = vadd.f32 %v1278_v28, %v826_v56  ;;  %v1327_v42 = vpop.f32.mrf.mxu3  ;;  %v1183_v59 = vpop.f32.mrf.mxu0  ;;  %v4361_v56 = vld [vmem:[%s6162_s3 + $0x198] sm:$0xff] }
 0x1c1   :  { %v5634_v10 = vadd.f32 %v1327_v42, %v875_v55  ;;  %v5636_v14 = vadd.f32 %v1183_v59, %v731_v17  ;;  %v1232_v11 = vpop.f32.mrf.mxu1  ;;  %1956 = vmatpush.bf16.msra.mxu0 %v4347_v4  ;;  %v4368_v59 = vld [vmem:[%s6162_s3 + $0x1d0] sm:$0xff] }
 0x1c2   :  { %v1430_v35 = vmax.f32 %v5586_v52, %v5632_v61  ;;  %v5640_v62 = vadd.f32 %v1232_v11, %v780_v57  ;;  %1969 = vmatpush.bf16.msra.mxu1 %v4355_v58  ;;  %2116 = vmatpush.bf16.msra.mxu2 %v4361_v56  ;;  %v4360_v57 = vld [vmem:[%s6162_s3 + $0x190] sm:$0xff]  ;;  %v831_v11 = vadd.f32 %v5337_v46, %v5097_v33  ;;  %v4367_v33 = vld [vmem:[%s6162_s3 + $0x1c8] sm:$0xff]  ;;  %v4386_v52 = vld [vmem:[%s6162_s3 + $0x260] sm:$0xff] }
 0x1c3   :  { %v1431_v60 = vmax.f32 %v5596_v15, %v5634_v10  ;;  %2128 = vmatpush.bf16.msra.mxu3 %v4370_v16  ;;  %v880_v16 = vadd.f32 %v5342_v26, %v5102_v36  ;;  %v785_v46 = vadd.f32 %v5346_v25, %v5106_v38  ;;  %v4344_v38 = vld [vmem:[%s6162_s3 + $0x110] sm:$0xff]  ;;  %v6290_v10 = vld [vmem:[#allocation62_spill] sm:$0xff] }
 0x1c4   :  { %v4352_v25 = vld [vmem:[%s6162_s3 + $0x150] sm:$0xff] }
 0x1c5   :  { %1957 = vmatpush.bf16.msra.mxu0 %v4346_v23  ;;  %v4392_v15 = vld [vmem:[%s6162_s3 + $0x290] sm:$0xff] }
 0x1c6   :  { %1970 = vmatpush.bf16.msra.mxu1 %v4354_v2  ;;  %2117 = vmatpush.bf16.msra.mxu2 %v4360_v57  ;;  %v6245_v2 = vld [vmem:[#allocation4_spill] sm:$0xff]  ;;  %v6246_v57 = vld [vmem:[#allocation41_spill] sm:$0xff] }
 0x1c7   :  { %v1281_v32 = vpop.f32.mrf.mxu2  ;;  %2129 = vmatpush.bf16.msra.mxu3 %v4369_v20  ;;  %v6289_v61 = vld [vmem:[#allocation25_spill] sm:$0xff] }
 0x1c8   :  { %v5676_v55 = vadd.f32 %v1281_v32, %v829_v53  ;;  %v1330_v17 = vpop.f32.mrf.mxu3  ;;  %v1185_v28 = vpop.f32.mrf.mxu0  ;;  %v736_v53 = vadd.f32 %v5344_v44, %v5104_v37  ;;  %v4358_v32 = vld [vmem:[%s6162_s3 + $0x180] sm:$0xff] }
 0x1c9   :  { %v5678_v8 = vadd.f32 %v1330_v17, %v878_v1  ;;  %v5680_v21 = vadd.f32 %v1185_v28, %v733_v31  ;;  %v1234_v9 = vpop.f32.mrf.mxu1  ;;  %1958 = vmatpush.bf16.msra.mxu0 %v4345_v12  ;;  %v834_v17 = vadd.f32 %v5348_v48, %v5120_v49  ;;  %v6243_v28 = vld [vmem:[#allocation3_spill] sm:$0xff] }
 0x1ca   :  { %v1432_v22 = vmax.f32 %v5636_v14, %v5676_v55  ;;  %v5684_v47 = vadd.f32 %v1234_v9, %v782_v29  ;;  %1971 = vmatpush.bf16.msra.mxu1 %v4353_v13  ;;  %2118 = vmatpush.bf16.msra.mxu2 %v4359_v63  ;;  %v4366_v29 = vld [vmem:[%s6162_s3 + $0x1c0] sm:$0xff]  ;;  %v6244_v9 = vld [vmem:[#allocation40_spill] sm:$0xff]  ;;  %v6247_v63 = vld [vmem:[#allocation5_spill] sm:$0xff] }
 0x1cb   :  { %2130 = vmatpush.bf16.msra.mxu3 %v4368_v59  ;;  %v883_v23 = vadd.f32 %v6244_v9, %v6243_v28  ;;  %v738_v59 = vadd.f32 %v6246_v57, %v6245_v2  ;;  %v4343_v12 = vld [vmem:[%s6162_s3 + $0x108] sm:$0xff]  ;;  %v4376_v14 = vld [vmem:[%s6162_s3 + $0x210] sm:$0xff] }
 0x1cc   :  { %v4351_v13 = vld [vmem:[%s6162_s3 + $0x148] sm:$0xff]  ;;  %v4384_v55 = vld [vmem:[%s6162_s3 + $0x250] sm:$0xff] }
 0x1cd   :  { %1959 = vmatpush.bf16.msra.mxu0 %v4344_v38  ;;  %v6251_v9 = vld [vmem:[#allocation7_spill] sm:$0xff] }
 0x1ce   :  { %1972 = vmatpush.bf16.msra.mxu1 %v4352_v25  ;;  %2119 = vmatpush.bf16.msra.mxu2 %v4358_v32  ;;  %v4342_v25 = vld [vmem:[%s6162_s3 + $0x100] sm:$0xff] }
 0x1cf   :  { %v1283_v4 = vpop.f32.mrf.mxu2  ;;  %2131 = vmatpush.bf16.msra.mxu3 %v4367_v33  ;;  %v4350_v32 = vld [vmem:[%s6162_s3 + $0x140] sm:$0xff] }
 0x1d0   :  { %v5720_v58 = vadd.f32 %v1283_v4, %v831_v11  ;;  %v1332_v56 = vpop.f32.mrf.mxu3  ;;  %v1188_v1 = vpop.f32.mrf.mxu0 }
 0x1d1   :  { %v5722_v31 = vadd.f32 %v1332_v56, %v880_v16  ;;  %v5724_v36 = vadd.f32 %v1188_v1, %v736_v53  ;;  %v1237_v26 = vpop.f32.mrf.mxu1  ;;  %v6248_v16 = vld [vmem:[#allocation42_spill] sm:$0xff]  ;;  %1960 = vmatpush.bf16.msra.mxu0 %v4343_v12 }
 0x1d2   :  { %v5728_v44 = vadd.f32 %v1237_v26, %v785_v46  ;;  %v787_v53 = vadd.f32 %v6248_v16, %v6247_v63  ;;  %1973 = vmatpush.bf16.msra.mxu1 %v4351_v13  ;;  %v1472_v16 = vld [vmem:[%s6163_s2] sm:$0x3] }
 0x1d3   :  { %2132 = vmatpush.bf16.msra.mxu3 %v4366_v29  ;;  %v6249_v29 = vld [vmem:[#allocation6_spill] sm:$0xff] }
 0x1d5   :  { %1961 = vmatpush.bf16.msra.mxu0 %v4342_v25  ;;  %v6255_v25 = vld [vmem:[#allocation10_spill] sm:$0xff] }
 0x1d6   :  { %1974 = vmatpush.bf16.msra.mxu1 %v4350_v32  ;;  %v6256_v32 = vld [vmem:[#allocation47_spill] sm:$0xff] }
 0x1d7   :  { %v1286_v11 = vpop.f32.mrf.mxu2 }
 0x1d8   :  { %v5758_v4 = vadd.f32 %v1286_v11, %v834_v17  ;;  %v1335_v49 = vpop.f32.mrf.mxu3  ;;  %v1190_v48 = vpop.f32.mrf.mxu0  ;;  %v6250_v17 = vld [vmem:[#allocation43_spill] sm:$0xff] }
 0x1d9   :  { %v5760_v33 = vadd.f32 %v1335_v49, %v883_v23  ;;  %v5762_v46 = vadd.f32 %v1190_v48, %v738_v59  ;;  %v1239_v56 = vpop.f32.mrf.mxu1  ;;  %v836_v28 = vadd.f32 %v6250_v17, %v6249_v29  ;;  %v6252_v23 = vld [vmem:[#allocation44_spill] sm:$0xff]  ;;  %v6254_v48 = vld [vmem:[#allocation45_spill] sm:$0xff]  ;;  %v839_v29 = vadd.f32 %v6256_v32, %v6255_v25 }
 0x1da   :  { %v5766_v26 = vadd.f32 %v1239_v56, %v787_v53  ;;  %v885_v2 = vadd.f32 %v6252_v23, %v6251_v9  ;;  %v6253_v49 = vld [vmem:[#allocation8_spill] sm:$0xff]  ;;  %v6257_v17 = vld [vmem:[#allocation9_spill] sm:$0xff]  ;;  %v6259_v23 = vld [vmem:[#allocation11_spill] sm:$0xff]  ;;  %v5799_v25 = vperm.slane %v1472_v16, 0 }
 0x1db   :  { %v741_v56 = vadd.f32 %v6254_v48, %v6253_v49 }
 0x1df   :  { %v1288_v57 = vpop.f32.mrf.mxu2 }
 0x1e0   :  { %v5780_v59 = vadd.f32 %v1288_v57, %v836_v28  ;;  %v1337_v11 = vpop.f32.mrf.mxu3  ;;  %v1193_v12 = vpop.f32.mrf.mxu0  ;;  %v6258_v28 = vld [vmem:[#allocation46_spill] sm:$0xff]  ;;  %v6260_v57 = vld [vmem:[#allocation48_spill] sm:$0xff] }
 0x1e1   :  { %v5782_v13 = vadd.f32 %v1337_v11, %v885_v2  ;;  %v1242_v63 = vpop.f32.mrf.mxu1  ;;  %v790_v9 = vadd.f32 %v6258_v28, %v6257_v17  ;;  %v888_v2 = vadd.f32 %v6260_v57, %v6259_v23  ;;  %v1392_v38 = vadd.f32 %v1193_v12, %v741_v56  ;;  %v6261_v56 = vld [vmem:[#allocation12_spill] sm:$0xff]  ;;  %v6267_v57 = vld [vmem:[#allocation15_spill] sm:$0xff] }
 0x1e2   :  { %v5801_v17 = vperm.slane %v1472_v16, 1 }
 0x1e3   :  { %v1393_v37 = vadd.f32 %v1242_v63, %v790_v9  ;;  %v6263_v63 = vld [vmem:[#allocation14_spill] sm:$0xff] }
 0x1e7   :  { %v1291_v11 = vpop.f32.mrf.mxu2 }
 0x1e8   :  { %v1394_v1 = vadd.f32 %v1291_v11, %v839_v29  ;;  %v1340_v53 = vpop.f32.mrf.mxu3  ;;  %v1195_v20 = vpop.f32.mrf.mxu0  ;;  %v6262_v29 = vld [vmem:[#allocation49_spill] sm:$0xff] }
 0x1e9   :  { %v1395_v49 = vadd.f32 %v1340_v53, %v888_v2  ;;  %v1244_v48 = vpop.f32.mrf.mxu1  ;;  %v743_v23 = vadd.f32 %v6262_v29, %v6261_v56  ;;  %v6264_v53 = vld [vmem:[#allocation51_spill] sm:$0xff]  ;;  %v6268_v2 = vld [vmem:[#allocation52_spill] sm:$0xff] }
 0x1ea   :  { %v1440_v42 = vmax.f32 %v1392_v38, %v1394_v1  ;;  %v841_v9 = vadd.f32 %v6264_v53, %v6263_v63  ;;  %v6265_v38 = vld [vmem:[#allocation13_spill] sm:$0xff]  ;;  %v890_v11 = vadd.f32 %v6268_v2, %v6267_v57  ;;  %v6271_v57 = vld [vmem:[#allocation18_spill] sm:$0xff]  ;;  %v6272_v2 = vld [vmem:[#allocation55_spill] sm:$0xff] }
 0x1eb   :  { %v1441_v32 = vmax.f32 %v1393_v37, %v1395_v49  ;;  %v6266_v37 = vld [vmem:[#allocation50_spill] sm:$0xff]  ;;  %v1396_v51 = vadd.f32 %v1195_v20, %v743_v23  ;;  %v4396_v23 = vld [vmem:[%s6162_s3 + $0x2b0] sm:$0xff] }
 0x1ec   :  { %v1456_v28 = vmax.f32 %v1424_v6, %v1440_v42  ;;  %v792_v16 = vadd.f32 %v6266_v37, %v6265_v38  ;;  %v6270_v37 = vld [vmem:[#allocation53_spill] sm:$0xff] }
 0x1ed   :  { %v1457_v12 = vmax.f32 %v1425_v40, %v1441_v32 }
 0x1ee   :  { %v1478_v1 = vadd.f32 %v5799_v25, %v1456_v28  ;;  %v1397_v32 = vadd.f32 %v1244_v48, %v792_v16  ;;  %v4397_v28 = vld [vmem:[%s6162_s3 + $0x2b8] sm:$0xff] }
 0x1ef   :  { %v1479_v3 = vadd.f32 %v5801_v17, %v1457_v12  ;;  %v1293_v45 = vpop.f32.mrf.mxu2  ;;  %v4405_v12 = vld [vmem:[%s6162_s3 + $0x2f8] sm:$0xff] }
 0x1f0   :  { %v1494_v6 = vmax.f32 %v1478_v1, 0.0  ;;  %v1398_v19 = vadd.f32 %v1293_v45, %v841_v9  ;;  %v1342_v40 = vpop.f32.mrf.mxu3  ;;  %v1198_v42 = vpop.f32.mrf.mxu0  ;;  %v6269_v9 = vld [vmem:[#allocation16_spill] sm:$0xff] }
 0x1f1   :  { %v1495_v49 = vmax.f32 %v1479_v3, 0.0  ;;  %v1399_v56 = vadd.f32 %v1342_v40, %v890_v11  ;;  %v1247_v29 = vpop.f32.mrf.mxu1  ;;  %v746_v16 = vadd.f32 %v6270_v37, %v6269_v9  ;;  %v844_v11 = vadd.f32 %v6272_v2, %v6271_v57  ;;  %v6276_v3 = vld [vmem:[#allocation56_spill] sm:$0xff] }
 0x1f2   :  { %v1510_v63 = vpack.c.bf16 %v1494_v6, %v1494_v6  ;;  %v1442_v53 = vmax.f32 %v1396_v51, %v1398_v19  ;;  %v4380_v57 = vld [vmem:[%s6162_s3 + $0x230] sm:$0xff] }
 0x1f3   :  { %v1511_v38 = vpack.c.bf16 %v1495_v49, %v1495_v49  ;;  %v1443_v1 = vmax.f32 %v1397_v32, %v1399_v56  ;;  %v1400_v40 = vadd.f32 %v1198_v42, %v746_v16  ;;  %v4395_v42 = vld [vmem:[%s6162_s3 + $0x2a8] sm:$0xff] }
 0x1f4   :  { %v1458_v20 = vmax.f32 %v1426_v54, %v1442_v53  ;;  %1805 = vmatmul.bf16.vlgmr.msrb.gmra.mxu2 %v1510_v63  ;;  %v795_v54 = vadd.f32 %v6274_v43, %v6273_v41  ;;  %v6277_v2 = vld [vmem:[#allocation20_spill] sm:$0xff]  ;;  %v6280_v41 = vld [vmem:[#allocation59_spill] sm:$0xff] }
 0x1f5   :  { %v1459_v48 = vmax.f32 %v1427_v27, %v1443_v1  ;;  %1818 = vmatmul.bf16.vlgmr.msrb.gmra.mxu3 %v1511_v38  ;;  %2428 = vmatpush.bf16.msrb.mxu2 %v4397_v28  ;;  %v6275_v27 = vld [vmem:[#allocation19_spill] sm:$0xff]  ;;  %v4381_v38 = vld [vmem:[%s6162_s3 + $0x238] sm:$0xff] }
 0x1f6   :  { %v1480_v24 = vadd.f32 %v5799_v25, %v1458_v20  ;;  %2441 = vmatpush.bf16.msrb.mxu3 %v4405_v12  ;;  %v893_v45 = vadd.f32 %v6276_v3, %v6275_v27  ;;  %v1401_v63 = vadd.f32 %v1247_v29, %v795_v54  ;;  %v6284_v54 = vld [vmem:[#allocation60_spill] sm:$0xff] }
 0x1f7   :  { %v1481_v6 = vadd.f32 %v5801_v17, %v1459_v48  ;;  %v1296_v51 = vpop.f32.mrf.mxu2  ;;  %v4389_v48 = vld [vmem:[%s6162_s3 + $0x278] sm:$0xff] }
 0x1f8   :  { %v1496_v19 = vmax.f32 %v1480_v24, 0.0  ;;  %v1402_v49 = vadd.f32 %v1296_v51, %v844_v11  ;;  %v1345_v32 = vpop.f32.mrf.mxu3  ;;  %v1200_v56 = vpop.f32.mrf.mxu0  ;;  %v6278_v11 = vld [vmem:[#allocation57_spill] sm:$0xff] }
 0x1f9   :  { %v1497_v28 = vmax.f32 %v1481_v6, 0.0  ;;  %v1403_v53 = vadd.f32 %v1345_v32, %v893_v45  ;;  %2429 = vmatpush.bf16.msrb.mxu2 %v4396_v23  ;;  %v1249_v12 = vpop.f32.mrf.mxu1  ;;  %v4403_v23 = vld [vmem:[%s6162_s3 + $0x2e8] sm:$0xff]  ;;  %v748_v24 = vadd.f32 %v6278_v11, %v6277_v2  ;;  %v4402_v45 = vld [vmem:[%s6162_s3 + $0x2e0] sm:$0xff] }
 0x1fa   :  { %v1544_v1 = vpack.c.bf16 %v1496_v19, %v1496_v19  ;;  %v1444_v20 = vmax.f32 %v1400_v40, %v1402_v49  ;;  %2442 = vmatpush.bf16.msrb.mxu3 %v4404_v30  ;;  %v6279_v30 = vld [vmem:[#allocation22_spill] sm:$0xff]  ;;  %v6288_v2 = vld [vmem:[#allocation63_spill] sm:$0xff] }
 0x1fb   :  { %v1545_v9 = vpack.c.bf16 %v1497_v28, %v1497_v28  ;;  %v1445_v29 = vmax.f32 %v1401_v63, %v1403_v53  ;;  %v846_v43 = vadd.f32 %v6280_v41, %v6279_v30  ;;  %v1404_v6 = vadd.f32 %v1200_v56, %v748_v24  ;;  %v4379_v63 = vld [vmem:[%s6162_s3 + $0x228] sm:$0xff] }
 0x1fc   :  { %v1460_v37 = vmax.f32 %v1428_v0, %v1444_v20  ;;  %1683 = vmatmul.bf16.vlgmr.msrb.gmra.mxu0 %v1544_v1  ;;  %v797_v0 = vadd.f32 %v6282_v39, %v6281_v34  ;;  %v4387_v56 = vld [vmem:[%s6162_s3 + $0x268] sm:$0xff]  ;;  %v4400_v39 = vld [vmem:[%s6162_s3 + $0x2d0] sm:$0xff] }
 0x1fd   :  { %v1461_v16 = vmax.f32 %v1429_v18, %v1445_v29  ;;  %1696 = vmatmul.bf16.vlgmr.msrb.gmra.mxu1 %v1545_v9  ;;  %2270 = vmatpush.bf16.msrb.mxu0 %v4381_v38  ;;  %v6283_v18 = vld [vmem:[#allocation23_spill] sm:$0xff]  ;;  %v6292_v41 = vld [vmem:[#allocation64_spill] sm:$0xff] }
 0x1fe   :  { %2283 = vmatpush.bf16.msrb.mxu1 %v4389_v48  ;;  %2430 = vmatpush.bf16.msrb.mxu2 %v4395_v42  ;;  %v895_v27 = vadd.f32 %v6284_v54, %v6283_v18  ;;  %v1405_v49 = vadd.f32 %v1249_v12, %v797_v0  ;;  %v1482_v53 = vadd.f32 %v5799_v25, %v1460_v37  ;;  %v4393_v12 = vld [vmem:[%s6162_s3 + $0x298] sm:$0xff]  ;;  %v4378_v29 = vld [vmem:[%s6162_s3 + $0x220] sm:$0xff] }
 0x1ff   :  { %2443 = vmatpush.bf16.msrb.mxu3 %v4403_v23  ;;  %v1298_v3 = vpop.f32.mrf.mxu2  ;;  %v1483_v1 = vadd.f32 %v5801_v17, %v1461_v16  ;;  %v4401_v48 = vld [vmem:[%s6162_s3 + $0x2d8] sm:$0xff]  ;;  %v6285_v23 = vld [vmem:[#allocation24_spill] sm:$0xff] }
 0x200   :  { %v1406_v51 = vadd.f32 %v1298_v3, %v846_v43  ;;  %v1347_v19 = vpop.f32.mrf.mxu3  ;;  %v1203_v40 = vpop.f32.mrf.mxu0  ;;  %v6286_v37 = vld [vmem:[#allocation61_spill] sm:$0xff]  ;;  %v1498_v24 = vmax.f32 %v1482_v53, 0.0 }
 0x201   :  { %v1407_v32 = vadd.f32 %v1347_v19, %v895_v27  ;;  %2271 = vmatpush.bf16.msrb.mxu0 %v4380_v57  ;;  %v1252_v28 = vpop.f32.mrf.mxu1  ;;  %v751_v16 = vadd.f32 %v6286_v37, %v6285_v23  ;;  %v6287_v57 = vld [vmem:[#allocation26_spill] sm:$0xff] }
 0x202   :  { %v1446_v38 = vmax.f32 %v1404_v6, %v1406_v51  ;;  %2284 = vmatpush.bf16.msrb.mxu1 %v4388_v50  ;;  %2431 = vmatpush.bf16.msrb.mxu2 %v4394_v5  ;;  %v849_v11 = vadd.f32 %v6288_v2, %v6287_v57  ;;  %v1499_v50 = vmax.f32 %v1483_v1, 0.0  ;;  %v1823_v19 = vpack.c.bf16 %v1498_v24, %v1498_v24  ;;  %v4377_v53 = vld [vmem:[%s6162_s3 + $0x218] sm:$0xff]  ;;  %v4399_v1 = vld [vmem:[%s6162_s3 + $0x2c8] sm:$0xff] }
 0x203   :  { %v1447_v20 = vmax.f32 %v1405_v49, %v1407_v32  ;;  %2444 = vmatpush.bf16.msrb.mxu3 %v4402_v45  ;;  %v1408_v18 = vadd.f32 %v1203_v40, %v751_v16  ;;  %v4385_v40 = vld [vmem:[%s6162_s3 + $0x258] sm:$0xff]  ;;  %v6297_v16 = vld [vmem:[#allocation67_spill] sm:$0xff] }
 0x204   :  { %v1462_v42 = vmax.f32 %v1430_v35, %v1446_v38  ;;  %v800_v35 = vadd.f32 %v6290_v10, %v6289_v61  ;;  %v1824_v38 = vpack.c.bf16 %v1499_v50, %v1499_v50  ;;  %v6296_v37 = vld [vmem:[#allocation30_spill] sm:$0xff]  ;;  %v6300_v2 = vld [vmem:[#allocation31_spill] sm:$0xff] }
 0x205   :  { %v1463_v9 = vmax.f32 %v1431_v60, %v1447_v20  ;;  %2272 = vmatpush.bf16.msrb.mxu0 %v4379_v63  ;;  %v6291_v60 = vld [vmem:[#allocation27_spill] sm:$0xff]  ;;  %v851_v57 = vadd.f32 %v6297_v16, %v6296_v37  ;;  %v4413_v16 = vld [vmem:[%s6162_s3 + $0x338] sm:$0xff] }
 0x206   :  { %v1484_v30 = vadd.f32 %v5799_v25, %v1462_v42  ;;  %2285 = vmatpush.bf16.msrb.mxu1 %v4387_v56  ;;  %2432 = vmatpush.bf16.msrb.mxu2 %v4393_v12  ;;  %v898_v43 = vadd.f32 %v6292_v41, %v6291_v60  ;;  %v1409_v45 = vadd.f32 %v1252_v28, %v800_v35  ;;  %v4391_v12 = vld [vmem:[%s6162_s3 + $0x288] sm:$0xff]  ;;  %v4429_v60 = vld [vmem:[%s6162_s3 + $0x3b8] sm:$0xff] }
 0x207   :  { %v1485_v5 = vadd.f32 %v5801_v17, %v1463_v9  ;;  %2445 = vmatpush.bf16.msrb.mxu3 %v4401_v48  ;;  %v1301_v34 = vpop.f32.mrf.mxu2  ;;  %v6293_v48 = vmax.f32 %v5640_v62, %v5678_v8  ;;  %v6294_v9 = vld [vmem:[#allocation28_spill] sm:$0xff]  ;;  %v6298_v62 = vld [vmem:[#allocation29_spill] sm:$0xff]  ;;  %v6299_v8 = vld [vmem:[#allocation66_spill] sm:$0xff] }
 0x208   :  { %v1500_v0 = vmax.f32 %v1484_v30, 0.0  ;;  %v1410_v54 = vadd.f32 %v1301_v34, %v849_v11  ;;  %v1350_v27 = vpop.f32.mrf.mxu3  ;;  %v1205_v51 = vpop.f32.mrf.mxu0  ;;  %v6301_v11 = vld [vmem:[#allocation68_spill] sm:$0xff]  ;;  %v4437_v41 = vld [vmem:[%s6162_s3 + $0x3f8] sm:$0xff] }
 0x209   :  { %v1501_v3 = vmax.f32 %v1485_v5, 0.0  ;;  %v1411_v6 = vadd.f32 %v1350_v27, %v898_v43  ;;  %2273 = vmatpush.bf16.msrb.mxu0 %v4378_v29  ;;  %v1254_v63 = vpop.f32.mrf.mxu1  ;;  %v6295_v29 = vld [vmem:[#allocation65_spill] sm:$0xff]  ;;  %v900_v24 = vadd.f32 %v6301_v11, %v6300_v2  ;;  %v4435_v2 = vld [vmem:[%s6162_s3 + $0x3e8] sm:$0xff] }
 0x20a   :  { %v1981_v49 = vpack.c.bf16 %v1500_v0, %v1500_v0  ;;  %v1448_v32 = vmax.f32 %v1408_v18, %v1410_v54  ;;  %2286 = vmatpush.bf16.msrb.mxu1 %v4386_v52  ;;  %2433 = vmatpush.bf16.msrb.mxu2 %v4392_v15  ;;  %v753_v23 = vadd.f32 %v6295_v29, %v6294_v9  ;;  %v4390_v52 = vld [vmem:[%s6162_s3 + $0x280] sm:$0xff]  ;;  %v4383_v0 = vld [vmem:[%s6162_s3 + $0x248] sm:$0xff] }
 0x20b   :  { %v1982_v56 = vpack.c.bf16 %v1501_v3, %v1501_v3  ;;  %v1449_v28 = vmax.f32 %v1409_v45, %v1411_v6  ;;  %2446 = vmatpush.bf16.msrb.mxu3 %v4400_v39  ;;  %v4398_v15 = vld [vmem:[%s6162_s3 + $0x2c0] sm:$0xff]  ;;  %v4375_v39 = vld [vmem:[%s6162_s3 + $0x208] sm:$0xff]  ;;  %v6302_v3 = vmax.f32 %v5680_v21, %v5720_v58 }
 0x20c   :  { %v1464_v20 = vmax.f32 %v1432_v22, %v1448_v32  ;;  %1962 = vmatmul.bf16.vlgmr.msra.gmra.mxu0 %v1823_v19  ;;  %2120 = vmatmul.bf16.vlgmr.msra.gmra.mxu2 %v1981_v49  ;;  %v802_v22 = vadd.f32 %v6299_v8, %v6298_v62  ;;  %v1412_v61 = vadd.f32 %v1205_v51, %v753_v23  ;;  %v4428_v51 = vld [vmem:[%s6162_s3 + $0x3b0] sm:$0xff]  ;;  %v6306_v21 = vld [vmem:[#allocation34_spill] sm:$0xff]  ;;  %v6307_v58 = vld [vmem:[#allocation71_spill] sm:$0xff] }
 0x20d   :  { %v1465_v42 = vmax.f32 %v6293_v48, %v1449_v28  ;;  %1975 = vmatmul.bf16.vlgmr.msra.gmra.mxu1 %v1824_v38  ;;  %2133 = vmatmul.bf16.vlgmr.msra.gmra.mxu3 %v1982_v56  ;;  %v4436_v19 = vld [vmem:[%s6162_s3 + $0x3f0] sm:$0xff]  ;;  %v6303_v49 = vmax.f32 %v5684_v47, %v5722_v31  ;;  %v854_v38 = vadd.f32 %v6307_v58, %v6306_v21  ;;  %v4382_v47 = vld [vmem:[%s6162_s3 + $0x240] sm:$0xff]  ;;  %v4419_v21 = vld [vmem:[%s6162_s3 + $0x368] sm:$0xff] }
 0x20e   :  { %2274 = vmatpush.bf16.msrb.mxu0 %v4377_v53  ;;  %2287 = vmatpush.bf16.msrb.mxu1 %v4385_v40  ;;  %v1413_v43 = vadd.f32 %v1254_v63, %v802_v22  ;;  %v1486_v5 = vadd.f32 %v5799_v25, %v1464_v20  ;;  %v6304_v63 = vld [vmem:[#allocation32_spill] sm:$0xff]  ;;  %v6305_v53 = vld [vmem:[#allocation69_spill] sm:$0xff]  ;;  %v6310_v48 = vld [vmem:[#allocation35_spill] sm:$0xff] }
 0x20f   :  { %2434 = vmatpush.bf16.msrb.mxu2 %v4391_v12  ;;  %2447 = vmatpush.bf16.msrb.mxu3 %v4399_v1  ;;  %v1303_v30 = vpop.f32.mrf.mxu2  ;;  %v1487_v18 = vadd.f32 %v5801_v17, %v1465_v42  ;;  %v756_v40 = vadd.f32 %v6305_v53, %v6304_v63  ;;  %v4374_v12 = vld [vmem:[%s6162_s3 + $0x200] sm:$0xff]  ;;  %v6308_v31 = vld [vmem:[#allocation33_spill] sm:$0xff]  ;;  %v6311_v42 = vld [vmem:[#allocation72_spill] sm:$0xff] }
 0x210   :  { %v1414_v10 = vadd.f32 %v1303_v30, %v851_v57  ;;  %v1352_v35 = vpop.f32.mrf.mxu3  ;;  %v1208_v27 = vpop.f32.mrf.mxu0  ;;  %v1502_v56 = vmax.f32 %v1486_v5, 0.0  ;;  %v6309_v1 = vld [vmem:[#allocation70_spill] sm:$0xff]  ;;  %v903_v9 = vadd.f32 %v6311_v42, %v6310_v48  ;;  %v4427_v22 = vld [vmem:[%s6162_s3 + $0x3a8] sm:$0xff] }
 0x211   :  { %v1415_v50 = vadd.f32 %v1352_v35, %v900_v24  ;;  %v1257_v6 = vpop.f32.mrf.mxu1  ;;  %v805_v20 = vadd.f32 %v6309_v1, %v6308_v31  ;;  %v1503_v29 = vmax.f32 %v1487_v18, 0.0  ;;  %v4421_v57 = vld [vmem:[%s6162_s3 + $0x378] sm:$0xff]  ;;  %v4410_v48 = vld [vmem:[%s6162_s3 + $0x320] sm:$0xff] }
 0x212   :  { %v1450_v34 = vmax.f32 %v1412_v61, %v1414_v10  ;;  %2275 = vmatpush.bf16.msrb.mxu0 %v4376_v14  ;;  %2288 = vmatpush.bf16.msrb.mxu1 %v4384_v55  ;;  %v1416_v55 = vadd.f32 %v1208_v27, %v756_v40  ;;  %v6314_v27 = vld [vmem:[#allocation36_spill] sm:$0xff]  ;;  %v4418_v42 = vld [vmem:[%s6162_s3 + $0x360] sm:$0xff] }
 0x213   :  { %v1451_v54 = vmax.f32 %v1413_v43, %v1415_v50  ;;  %2435 = vmatpush.bf16.msrb.mxu2 %v4390_v52  ;;  %2448 = vmatpush.bf16.msrb.mxu3 %v4398_v15  ;;  %v1417_v24 = vadd.f32 %v1257_v6, %v805_v20  ;;  %v2139_v52 = vpack.c.bf16 %v1502_v56, %v1502_v56  ;;  %v4420_v43 = vld [vmem:[%s6162_s3 + $0x370] sm:$0xff] }
 0x214   :  { %v1466_v45 = vmax.f32 %v6302_v3, %v1450_v34  ;;  %v2140_v10 = vpack.c.bf16 %v1503_v29, %v1503_v29  ;;  %v6312_v50 = vmax.f32 %v5724_v36, %v5758_v4  ;;  %v4426_v34 = vld [vmem:[%s6162_s3 + $0x3a0] sm:$0xff]  ;;  %v6315_v36 = vld [vmem:[#allocation73_spill] sm:$0xff] }
 0x215   :  { %v1467_v32 = vmax.f32 %v6303_v49, %v1451_v54  ;;  %v758_v4 = vadd.f32 %v6315_v36, %v6314_v27  ;;  %v6316_v3 = vld [vmem:[#allocation38_spill] sm:$0xff]  ;;  %v4444_v36 = vld [vmem:[%s6166_s5 + $0x30] sm:$0xff] }
 0x216   :  { %v1488_v28 = vadd.f32 %v5799_v25, %v1466_v45  ;;  %2276 = vmatpush.bf16.msrb.mxu0 %v4375_v39  ;;  %2289 = vmatpush.bf16.msrb.mxu1 %v4383_v0  ;;  %v4434_v39 = vld [vmem:[%s6162_s3 + $0x3e0] sm:$0xff]  ;;  %v6313_v0 = vmax.f32 %v5728_v44, %v5760_v33  ;;  %v856_v45 = vadd.f32 %v5482_v7, %v6316_v3  ;;  %v4411_v7 = vld [vmem:[%s6162_s3 + $0x328] sm:$0xff]  ;;  %v4445_v27 = vld [vmem:[%s6166_s5 + $0x38] sm:$0xff] }
 0x217   :  { %2744 = vmatpush.bf16.msra.mxu2 %v4429_v60  ;;  %2757 = vmatpush.bf16.msra.mxu3 %v4437_v41  ;;  %v1489_v23 = vadd.f32 %v5801_v17, %v1467_v32  ;;  %v1306_v37 = vpop.f32.mrf.mxu2  ;;  %v4412_v41 = vld [vmem:[%s6162_s3 + $0x330] sm:$0xff]  ;;  %v6318_v49 = vld [vmem:[#allocation74_spill] sm:$0xff]  ;;  %v6319_v44 = vld [vmem:[#allocation39_spill] sm:$0xff] }
 0x218   :  { %v1504_v14 = vmax.f32 %v1488_v28, 0.0  ;;  %v1418_v62 = vadd.f32 %v1306_v37, %v854_v38  ;;  %v1355_v8 = vpop.f32.mrf.mxu3  ;;  %v1210_v54 = vpop.f32.mrf.mxu0  ;;  %v6320_v33 = vld [vmem:[#allocation75_spill] sm:$0xff]  ;;  %v4425_v28 = vld [vmem:[%s6162_s3 + $0x398] sm:$0xff]  ;;  %v4432_v37 = vld [vmem:[%s6162_s3 + $0x3d0] sm:$0xff] }
 0x219   :  { %v1505_v11 = vmax.f32 %v1489_v23, 0.0  ;;  %v1419_v30 = vadd.f32 %v1355_v8, %v903_v9  ;;  %v905_v63 = vadd.f32 %v6320_v33, %v6319_v44  ;;  %v1420_v58 = vadd.f32 %v1210_v54, %v758_v4  ;;  %v4424_v23 = vld [vmem:[%s6162_s3 + $0x390] sm:$0xff]  ;;  %v4422_v8 = vld [vmem:[%s6162_s3 + $0x380] sm:$0xff]  ;;  %v4441_v44 = vld [vmem:[%s6166_s5 + $0x18] sm:$0xff] }
 0x21a   :  { %v2297_v15 = vpack.c.bf16 %v1504_v14, %v1504_v14  ;;  %v1452_v61 = vmax.f32 %v1416_v55, %v1418_v62  ;;  %2277 = vmatpush.bf16.msrb.mxu0 %v4374_v12  ;;  %2290 = vmatpush.bf16.msrb.mxu1 %v4382_v47  ;;  %v4433_v12 = vld [vmem:[%s6162_s3 + $0x3d8] sm:$0xff]  ;;  %v6321_v9 = vmax.f32 %v5762_v46, %v5780_v59  ;;  %v4423_v55 = vld [vmem:[%s6162_s3 + $0x388] sm:$0xff]  ;;  %v4416_v62 = vld [vmem:[%s6162_s3 + $0x350] sm:$0xff] }
 0x21b   :  { %2745 = vmatpush.bf16.msra.mxu2 %v4428_v51  ;;  %2758 = vmatpush.bf16.msra.mxu3 %v4436_v19  ;;  %v2298_v35 = vpack.c.bf16 %v1505_v11, %v1505_v11  ;;  %v1453_v60 = vmax.f32 %v1417_v24, %v1419_v30  ;;  %v1259_v51 = vpop.f32.mrf.mxu1  ;;  %v6317_v19 = vld [vmem:[#allocation37_spill] sm:$0xff]  ;;  %v4407_v11 = vld [vmem:[%s6162_s3 + $0x308] sm:$0xff] }
 0x21c   :  { %v1468_v5 = vmax.f32 %v6312_v50, %v1452_v61  ;;  %2436 = vmatmul.bf16.vlgmr.msrb.gmra.mxu2 %v2297_v15  ;;  %v807_v32 = vadd.f32 %v6318_v49, %v6317_v19  ;;  %v4409_v46 = vld [vmem:[%s6162_s3 + $0x318] sm:$0xff]  ;;  %v4415_v24 = vld [vmem:[%s6162_s3 + $0x348] sm:$0xff]  ;;  %v4406_v15 = vld [vmem:[%s6162_s3 + $0x300] sm:$0xff] }
 0x21d   :  { %v1469_v18 = vmax.f32 %v6313_v0, %v1453_v60  ;;  %2278 = vmatmul.bf16.vlgmr.msrb.gmra.mxu0 %v2139_v52  ;;  %2291 = vmatmul.bf16.vlgmr.msrb.gmra.mxu1 %v2140_v10  ;;  %v4417_v59 = vld [vmem:[%s6162_s3 + $0x358] sm:$0xff]  ;;  %v4414_v61 = vld [vmem:[%s6162_s3 + $0x340] sm:$0xff] }
 0x21e   :  { %2586 = vmatpush.bf16.msra.mxu0 %v4413_v16  ;;  %2599 = vmatpush.bf16.msra.mxu1 %v4421_v57  ;;  %v6042_v6 = vadd.f32 %v5799_v25, %v1468_v5  ;;  %v1421_v47 = vadd.f32 %v1259_v51, %v807_v32  ;;  %v6322_v16 = vmax.f32 %v5766_v26, %v5782_v13  ;;  %v4431_v26 = vld [vmem:[%s6162_s3 + $0x3c8] sm:$0xff] }
 0x21f   :  { %2746 = vmatpush.bf16.msra.mxu2 %v4427_v22  ;;  %2759 = vmatpush.bf16.msra.mxu3 %v4435_v2  ;;  %v6049_v53 = vadd.f32 %v5801_v17, %v1469_v18  ;;  %v1308_v40 = vpop.f32.mrf.mxu2 }
 0x220   :  { %2449 = vmatmul.bf16.vlgmr.msrb.gmra.mxu3 %v2298_v35  ;;  %v1422_v38 = vadd.f32 %v1308_v40, %v856_v45  ;;  %v1357_v56 = vpop.f32.mrf.mxu3  ;;  %v1506_v10 = vmax.f32 %v6042_v6, 0.0  ;;  %v4443_v45 = vld [vmem:[%s6166_s5 + $0x28] sm:$0xff]  ;;  %v4442_v6 = vld [vmem:[%s6166_s5 + $0x20] sm:$0xff] }
 0x221   :  { %v1423_v31 = vadd.f32 %v1357_v56, %v905_v63  ;;  %v1507_v35 = vmax.f32 %v6049_v53, 0.0  ;;  %v4440_v53 = vld [vmem:[%s6166_s5 + $0x10] sm:$0xff] }
 0x222   :  { %2587 = vmatpush.bf16.msra.mxu0 %v4412_v41  ;;  %2600 = vmatpush.bf16.msra.mxu1 %v4420_v43  ;;  %v1454_v1 = vmax.f32 %v1420_v58, %v1422_v38  ;;  %v2455_v60 = vpack.c.bf16 %v1506_v10, %v1506_v10  ;;  %v4438_v58 = vld [vmem:[%s6166_s5] sm:$0xff] }
 0x223   :  { %2747 = vmatpush.bf16.msra.mxu2 %v4426_v34  ;;  %2760 = vmatpush.bf16.msra.mxu3 %v4434_v39  ;;  %v1455_v20 = vmax.f32 %v1421_v47, %v1423_v31  ;;  %v2456_v41 = vpack.c.bf16 %v1507_v35, %v1507_v35  ;;  %v4447_v10 = vld [vmem:[%s6165_s6] ss:$0 sm:$0xff] }
 0x224   :  { %v1470_v29 = vmax.f32 %v6321_v9, %v1454_v1 }
 0x225   :  { %v1471_v57 = vmax.f32 %v6322_v16, %v1455_v20 }
 0x226   :  { %2588 = vmatpush.bf16.msra.mxu0 %v4411_v7  ;;  %2601 = vmatpush.bf16.msra.mxu1 %v4419_v21  ;;  %v1492_v14 = vadd.f32 %v5799_v25, %v1470_v29  ;;  %v4408_v25 = vld [vmem:[%s6162_s3 + $0x310] sm:$0xff]  ;;  %v4439_v21 = vld [vmem:[%s6166_s5 + $0x8] sm:$0xff] }
 0x227   :  { %2748 = vmatpush.bf16.msra.mxu2 %v4425_v28  ;;  %2761 = vmatpush.bf16.msra.mxu3 %v4433_v12  ;;  %v1493_v13 = vadd.f32 %v5801_v17, %v1471_v57  ;;  %v4430_v17 = vld [vmem:[%s6162_s3 + $0x3c0] sm:$0xff] }
 0x228   :  { %v1508_v22 = vmax.f32 %v1492_v14, 0.0 }
 0x229   :  { %v1509_v2 = vmax.f32 %v1493_v13, 0.0 }
 0x22a   :  { %2589 = vmatpush.bf16.msra.mxu0 %v4410_v48  ;;  %2602 = vmatpush.bf16.msra.mxu1 %v4418_v42  ;;  %v2613_v30 = vpack.c.bf16 %v1508_v22, %v1508_v22 }
 0x22b   :  { %2749 = vmatpush.bf16.msra.mxu2 %v4424_v23  ;;  %2762 = vmatpush.bf16.msra.mxu3 %v4432_v37  ;;  %v2614_v52 = vpack.c.bf16 %v1509_v2, %v1509_v2 }
 0x22e   :  { %2590 = vmatpush.bf16.msra.mxu0 %v4409_v46  ;;  %2603 = vmatpush.bf16.msra.mxu1 %v4417_v59 }
 0x22f   :  { %2750 = vmatpush.bf16.msra.mxu2 %v4423_v55  ;;  %2763 = vmatpush.bf16.msra.mxu3 %v4431_v26 }
 0x232   :  { %2591 = vmatpush.bf16.msra.mxu0 %v4408_v25  ;;  %2604 = vmatpush.bf16.msra.mxu1 %v4416_v62 }
 0x233   :  { %2751 = vmatpush.bf16.msra.mxu2 %v4422_v8  ;;  %2764 = vmatpush.bf16.msra.mxu3 %v4430_v17  ;;  %v4446_v8 = vld [vmem:[%s6164_s4] ss:$0 sm:$0xff] }
 0x236   :  { %2752 = vmatmul.bf16.vlgmr.msra.gmra.mxu2 %v2613_v30  ;;  %2765 = vmatmul.bf16.vlgmr.msra.gmra.mxu3 %v2614_v52 }
 0x237   :  { %2592 = vmatpush.bf16.msra.mxu0 %v4407_v11  ;;  %2605 = vmatpush.bf16.msra.mxu1 %v4415_v24 }
 0x23b   :  { %2593 = vmatpush.bf16.msra.mxu0 %v4406_v15  ;;  %2606 = vmatpush.bf16.msra.mxu1 %v4414_v61  ;;  %v14_v61 = vstv %s6168_s8 }
 0x23c   :  { %15 = vst [vmem:[#allocation2] sm:$0x1] %v14_v61 }
 0x23e   :  { %2594 = vmatmul.bf16.vlgmr.msra.gmra.mxu0 %v2455_v60  ;;  %2607 = vmatmul.bf16.vlgmr.msra.gmra.mxu1 %v2456_v41  ;;  %v4448_v41 = vld [vmem:[%s6167_s7] ss:$0 sm:$0xff] }
 0x23f   :  { %2846 = vmatpush.bf16.msrb.mxu0 %v4445_v27 }
 0x243   :  { %2847 = vmatpush.bf16.msrb.mxu0 %v4444_v36 }
 0x247   :  { %2848 = vmatpush.bf16.msrb.mxu0 %v4443_v45 }
 0x24b   :  { %2849 = vmatpush.bf16.msrb.mxu0 %v4442_v6 }
 0x24f   :  { %2850 = vmatpush.bf16.msrb.mxu0 %v4441_v44 }
 0x253   :  { %2851 = vmatpush.bf16.msrb.mxu0 %v4440_v53 }
 0x257   :  { %2852 = vmatpush.bf16.msrb.mxu0 %v4439_v21 }
 0x25b   :  { %2853 = vmatpush.bf16.msrb.mxu0 %v4438_v58 }
 0x277   :  { %v1806_v43 = vpop.f32.mrf.mxu2 }
 0x278   :  { %v1819_v50 = vpop.f32.mrf.mxu3 }
 0x279   :  { %v1684_v5 = vpop.f32.mrf.mxu0 }
 0x27a   :  { %v1697_v34 = vpop.f32.mrf.mxu1 }
 0x27b   :  { %v1698_v47 = vadd.f32 %v1697_v34, %v1684_v5  ;;  %v4449_v34 = vld [vmem:[#allocation2] ss:$0 sm:$0xff] }
 0x27d   :  { %v1807_v20 = vadd.f32 %v1806_v43, %v1698_v47 }
 0x27f   :  { %v1808_v39 = vpop.f32.mrf.mxu2  ;;  %v1820_v42 = vadd.f32 %v1819_v50, %v1807_v20 }
 0x280   :  { %v1821_v0 = vpop.f32.mrf.mxu3 }
 0x281   :  { %v1686_v18 = vpop.f32.mrf.mxu0 }
 0x282   :  { %v1699_v54 = vpop.f32.mrf.mxu1 }
 0x289   :  { %v1963_v4 = vpop.f32.mrf.mxu0 }
 0x28a   :  { %v1976_v3 = vpop.f32.mrf.mxu1 }
 0x28b   :  { %v1977_v48 = vadd.f32 %v1976_v3, %v1963_v4 }
 0x28d   :  { %v1980_v29 = vadd.f32 %v1977_v48, %v1820_v42 }
 0x28f   :  { %v2121_v51 = vpop.f32.mrf.mxu2 }
 0x290   :  { %v2134_v19 = vpop.f32.mrf.mxu3 }
 0x291   :  { %v1965_v49 = vpop.f32.mrf.mxu0  ;;  %v2135_v9 = vadd.f32 %v2134_v19, %v2121_v51 }
 0x292   :  { %v1978_v32 = vpop.f32.mrf.mxu1 }
 0x293   :  { %v2138_v37 = vadd.f32 %v2135_v9, %v1980_v29 }
 0x297   :  { %v2123_v33 = vpop.f32.mrf.mxu2 }
 0x298   :  { %v2136_v63 = vpop.f32.mrf.mxu3 }
 0x29a   :  { %v2279_v40 = vpop.f32.mrf.mxu0  ;;  %v2292_v7 = vpop.f32.mrf.mxu1 }
 0x29b   :  { %v2293_v23 = vadd.f32 %v2292_v7, %v2279_v40 }
 0x29d   :  { %v2296_v46 = vadd.f32 %v2293_v23, %v2138_v37 }
 0x29f   :  { %v2437_v38 = vpop.f32.mrf.mxu2 }
 0x2a2   :  { %v2281_v28 = vpop.f32.mrf.mxu0  ;;  %v2294_v12 = vpop.f32.mrf.mxu1 }
 0x2a3   :  { %v2450_v56 = vpop.f32.mrf.mxu3 }
 0x2a4   :  { %v2451_v16 = vadd.f32 %v2450_v56, %v2437_v38 }
 0x2a6   :  { %v2454_v26 = vadd.f32 %v2451_v16, %v2296_v46 }
 0x2a7   :  { %v2439_v31 = vpop.f32.mrf.mxu2 }
 0x2ab   :  { %v2452_v1 = vpop.f32.mrf.mxu3 }
 0x2b9   :  { %v2753_v57 = vpop.f32.mrf.mxu2  ;;  %v2766_v14 = vpop.f32.mrf.mxu3 }
 0x2ba   :  { %v2767_v25 = vadd.f32 %v2766_v14, %v2753_v57 }
 0x2bb   :  { %v2595_v59 = vpop.f32.mrf.mxu0  ;;  %v2608_v55 = vpop.f32.mrf.mxu1 }
 0x2bc   :  { %v2609_v13 = vadd.f32 %v2608_v55, %v2595_v59 }
 0x2be   :  { %v2612_v62 = vadd.f32 %v2609_v13, %v2454_v26 }
 0x2c0   :  { %v2770_v17 = vadd.f32 %v2767_v25, %v2612_v62 }
 0x2c1   :  { %v2755_v22 = vpop.f32.mrf.mxu2  ;;  %v2768_v2 = vpop.f32.mrf.mxu3 }
 0x2c2   :  { %v2775_v11 = vadd.f32 %v4446_v8, %v2770_v17 }
 0x2c3   :  { %v2597_v24 = vpop.f32.mrf.mxu0  ;;  %v2610_v30 = vpop.f32.mrf.mxu1 }
 0x2c4   :  { %v2776_v52 = vmax.f32 %v2775_v11, 0.0 }
 0x2c6   :  { %v2777_v15 = vpack.c.bf16 %v2776_v52, %v2776_v52 }
 0x2c8   :  { %2854 = vmatmul.bf16.vlgmr.msrb.gmra.mxu0 %v2777_v15 }
 0x345   :  { %v2855_v35 = vpop.f32.mrf.mxu0 }
 0x346   :  { %v2856_v60 = vadd.f32 %v4447_v10, %v2855_v35 }
 0x348   :  { %v2859_v43 = vmax.f32 %v2856_v60, 0.0 }
 0x34a   :  { %v2864_v50 = vmul.f32 %v4448_v41, %v2859_v43 }
 0x34c   :  { %2865 = vadd.xlane.f32.xlu0 %v2864_v50 }
 0x34d   :  { %v2857_v5 = vpop.f32.mrf.mxu0 }
 0x3bf   :  { %v2866_v39 = vpop.xlane.xlu0 %2865 }
 0x3c0   :  { %v2871_v0 = vadd.f32 %v4449_v34, %v2866_v39 }
 0x3c2   :  { %v4193_v18 = vmul.f32 -1.442695, %v2871_v0 }
 0x3c4   :  { %4450 = vpow2.f32 %v4193_v18 }
 0x3ca   :  { %v4451_v54 = vpop.eup %4450 }
 0x3cb   :  { %v2875_v27 = vadd.f32 1.0, %v4451_v54 }
 0x3cd   :  { %4452 = vrcp.f32 %v2875_v27  ;;  %v2887_v45 = vand.u32 2147483648, %v2875_v27  ;;  %v2885_v51 = vand.u32 2147483647, %v2875_v27  ;;  %vm2881_vm1 = vweird.f32 %v2875_v27 }
 0x3cf   :  { %v2888_v49 = vor.u32 1.1754944e-38, %v2887_v45  ;;  %vm2886_vm4 = vcmp.eq.f32.partialorder %v2885_v51, 8.507059e+37 }
 0x3d3   :  { %v4453_v36 = vpop.eup %4452 }
 0x3d4   :  { %v2877_v4 = vmul.f32 %v4453_v36, %v2875_v27  ;;  %vm2882_vm0 = vweird.f32 %v4453_v36 }
 0x3d5   :  { %vm2883_vm2 = vmor %vm2881_vm1, %vm2882_vm0 }
 0x3d6   :  { %v2878_v3 = vsub.f32 1.0, %v2877_v4 }
 0x3d8   :  { %v2879_v6 = vmul.f32 %v4453_v36, %v2878_v3 }
 0x3da   :  { %v2880_v19 = vadd.f32 %v4453_v36, %v2879_v6 }
 0x3dc   :  { %v2884_v32 = vsel %vm2883_vm2, %v4453_v36, %v2880_v19 }
 0x3dd   :  { %v2889_v44 = vsel %vm2886_vm4, %v2888_v49, %v2884_v32 }
 0x3de   :  { %2892 = vst.msk [vmem:[%s6169_s9] sm:$0xff] %vm2891_vm3, %v2889_v44 }

</bundles_post_ra>
